<compile_context>
chip_gen: v6e
topology: v6e:2x2x1
jax: 0.10.0
libtpu: 0.0.40
codegen_flags: <defaults>
</compile_context>

<pallas_src>
import functools

import jax
import jax.numpy as jnp
from jax import lax
from jax.experimental import pallas as pl
from jax.experimental.pallas import tpu as pltpu

VMEM = pl.BlockSpec(memory_space=pltpu.MemorySpace.VMEM)
SMEM = pl.BlockSpec(memory_space=pltpu.MemorySpace.SMEM)


# ---------------------------------------------------------------------------
# Kernel 1: fused image-domain chain of one cascade
# ---------------------------------------------------------------------------
def _image_chain_kernel(xr_ref, xi_ref, sr_ref, si_ref,
                        w0_ref, b0_ref, w1_ref, b1_ref, w2_ref, b2_ref, a_ref,
                        er_ref, ei_ref, buf_ref, *, X, Y):
    Yp = Y + 2
    XYp = X * Yp                      # conv output grid (row stride Yp)
    PADF = (X + 2) * Yp               # zero-padded image, flattened

    sr = sr_ref[...]                  # (C, PADF) padded+flattened sens maps
    si = si_ref[...]
    xr = xr_ref[...]                  # (C, PADF) padded+flattened ifft(kspace)
    xi = xi_ref[...]

    # sens_reduce: sum_c x * conj(s); the zero padding is preserved (0 * 0).
    pr = jnp.sum(xr * sr + xi * si, axis=0, keepdims=True)     # (1, PADF)
    pi = jnp.sum(xi * sr - xr * si, axis=0, keepdims=True)

    # Scratch holds the zero-padded activations of the current layer.
    buf_ref[...] = jnp.zeros_like(buf_ref)
    buf_ref[0:1, 0:PADF] = pr
    buf_ref[1:2, 0:PADF] = pi

    # Columns y in [Y, Yp) of the (X, Yp) output grid are invalid (windows
    # hanging off the right edge); they map onto padding cells of the next
    # layer's buffer and must be stored as zeros (this implements zero-pad).
    col = lax.broadcasted_iota(jnp.int32, (1, XYp), 1) % Yp
    valid = col < Y

    def conv_layer(w_ref, b_ref, cin, act):
        # w_ref: (9, Cout, Cin) with tap index k = kx*3 + ky; b_ref: (Cout, 1)
        acc = None
        for kx in range(3):
            for ky in range(3):
                s = kx * Yp + ky
                tap = buf_ref[0:cin, s: s + XYp]              # (Cin, XYp)
                wk = w_ref[kx * 3 + ky]                       # (Cout, Cin)
                d = jnp.dot(wk, tap, preferred_element_type=jnp.float32)
                acc = d if acc is None else acc + d
        out = acc + b_ref[...]
        if act:
            out = jnp.where(out >= 0.0, out, a_ref[0] * out)  # PReLU
        return out                                            # (Cout, XYp)

    hidden = w0_ref.shape[1]
    o = conv_layer(w0_ref, b0_ref, 2, True)
    buf_ref[0:hidden, Yp + 1: Yp + 1 + XYp] = jnp.where(valid, o, 0.0)
    o = conv_layer(w1_ref, b1_ref, hidden, True)
    buf_ref[0:hidden, Yp + 1: Yp + 1 + XYp] = jnp.where(valid, o, 0.0)
    o = conv_layer(w2_ref, b2_ref, hidden, False)             # (2, XYp)

    # sens_expand: complex_mul(pred, sens).  The denoised image lives on the
    # (X, Yp) output grid, i.e. shifted by Yp + 1 w.r.t. the padded layout, so
    # slice the sens maps accordingly.  Invalid columns hit zero-padded sens.
    srs = sr[:, Yp + 1: Yp + 1 + XYp]
    sis = si[:, Yp + 1: Yp + 1 + XYp]
    prd = o[0:1]
    pid = o[1:2]
    er_ref[...] = prd * srs - pid * sis
    ei_ref[...] = prd * sis + pid * srs


def image_chain(xrp, xip, srp, sip, p, *, X, Y):
    C, PADF = xrp.shape
    Yp = Y + 2
    XYp = X * Yp
    hidden = p["conv_w_k"][0].shape[1]
    flat = PADF + Yp                  # tail slack so every tap slice is in-bounds
    return pl.pallas_call(
        functools.partial(_image_chain_kernel, X=X, Y=Y),
        out_shape=(jax.ShapeDtypeStruct((C, XYp), jnp.float32),
                   jax.ShapeDtypeStruct((C, XYp), jnp.float32)),
        in_specs=[VMEM] * 10 + [SMEM],
        out_specs=(VMEM, VMEM),
        scratch_shapes=[pltpu.VMEM((hidden, flat), jnp.float32)],
    )(xrp, xip, srp, sip,
      p["conv_w_k"][0], p["conv_b_col"][0],
      p["conv_w_k"][1], p["conv_b_col"][1],
      p["conv_w_k"][2], p["conv_b_col"][2],
      p["prelu_a"])


# ---------------------------------------------------------------------------
# Kernel 2: data consistency, coil-tiled grid (parallel -> both TCs on v7x)
# ---------------------------------------------------------------------------
def _dc_kernel(lam_ref, pkr_ref, pki_ref, kr_ref, ki_ref, m_ref, or_ref, oi_ref):
    lam = lam_ref[0]
    msk = (m_ref[...] != 0.0)[None]
    or_ref[...] = jnp.where(msk, pkr_ref[...] - kr_ref[...], 0.0) * lam
    oi_ref[...] = jnp.where(msk, pki_ref[...] - ki_ref[...], 0.0) * lam


def data_consistency(lam, pkr, pki, kr, ki, m2d):
    C, X, Y = kr.shape
    coil = pl.BlockSpec((1, X, Y), lambda c: (c, 0, 0))
    return pl.pallas_call(
        _dc_kernel,
        grid=(C,),
        out_shape=(jax.ShapeDtypeStruct((C, X, Y), jnp.float32),
                   jax.ShapeDtypeStruct((C, X, Y), jnp.float32)),
        in_specs=[SMEM, coil, coil, coil, coil,
                  pl.BlockSpec((X, Y), lambda c: (0, 0))],
        out_specs=(coil, coil),
        compiler_params=pltpu.CompilerParams(
            dimension_semantics=("parallel",)),
    )(lam, pkr, pki, kr, ki, m2d)


# ---------------------------------------------------------------------------
# Kernel 3: fused sens_reduce (of DC term) + weighted average, lane-dense
#           (C, X*Y) views, k-space updated in place via input_output_aliases.
# ---------------------------------------------------------------------------
def _wavg_kernel(p_ref, kr_ref, ki_ref, pkr_ref, pki_ref, tr_ref, ti_ref,
                 sr_ref, si_ref, okr_ref, oki_ref):
    sr, si = sr_ref[...], si_ref[...]
    tr, ti = tr_ref[...], ti_ref[...]
    sxr = jnp.sum(tr * sr + ti * si, axis=0, keepdims=True)   # (1, X*Y)
    sxi = jnp.sum(ti * sr - tr * si, axis=0, keepdims=True)
    p = p_ref[0]
    okr_ref[...] = p * (kr_ref[...] + pkr_ref[...]) + (1.0 - p) * sxr
    oki_ref[...] = p * (ki_ref[...] + pki_ref[...]) + (1.0 - p) * sxi


def weighted_average(p, kr, ki, pkr, pki, tr, ti, srf, sif):
    C, XY = kr.shape
    return pl.pallas_call(
        _wavg_kernel,
        out_shape=(jax.ShapeDtypeStruct((C, XY), jnp.float32),
                   jax.ShapeDtypeStruct((C, XY), jnp.float32)),
        in_specs=[SMEM] + [VMEM] * 8,
        out_specs=(VMEM, VMEM),
        input_output_aliases={1: 0, 2: 1},   # kr, ki written in place
    )(p, kr, ki, pkr, pki, tr, ti, srf, sif)


# ---------------------------------------------------------------------------
# Glue (FFTs, layout plumbing) and the full VSNetBlock forward
# ---------------------------------------------------------------------------
def _pad_flat(a):
    # (C, X, Y) -> (C, (X+2)*(Y+2)) zero-padded, row-flattened
    return jnp.pad(a, ((0, 0), (1, 1), (1, 1))).reshape(a.shape[0], -1)


def vsnet_block_forward(kspace, sensitivity_maps, mask, params):
    """Port of VSNetBlock.forward (fft_centered=False, norm='backward',
    spatial_dims=(-2, -1), coil_dim=1).

    kspace / sensitivity_maps: (1, C, X, Y, 2); mask: (1, 1, X, Y, 1).
    Returns cascaded multicoil k-space, shape (1, C, X, Y, 2) — same as the
    torch code (its broadcasting is only well-defined for batch == 1).
    """
    kr, ki = kspace[0, ..., 0], kspace[0, ..., 1]
    sr, si = sensitivity_maps[0, ..., 0], sensitivity_maps[0, ..., 1]
    m2d = mask[0, 0, :, :, 0].astype(jnp.float32)
    C, X, Y = kr.shape
    Yp = Y + 2
    XY = X * Y

    srp, sip = _pad_flat(sr), _pad_flat(si)            # padded sens (once)
    srf, sif = sr.reshape(C, XY), si.reshape(C, XY)    # lane-dense flat sens

    for p in params:
        # pred = sens_reduce(kspace) -> denoiser -> sens_expand   (one kernel)
        xc = jnp.fft.ifftn(lax.complex(kr, ki), axes=(-2, -1), norm="backward")
        xrp, xip = _pad_flat(jnp.real(xc)), _pad_flat(jnp.imag(xc))
        erp, eip = image_chain(xrp, xip, srp, sip, p, X=X, Y=Y)
        er = erp.reshape(C, X, Yp)[:, :, 0:Y]
        ei = eip.reshape(C, X, Yp)[:, :, 0:Y]
        pc = jnp.fft.fftn(lax.complex(er, ei), axes=(-2, -1), norm="backward")
        pkr, pki = jnp.real(pc), jnp.imag(pc)
        # sx = data_consistency_block(pred, kspace, mask)
        dr, di = data_consistency(p["dc_lambda"], pkr, pki, kr, ki, m2d)
        # sx = sens_reduce(sx); kspace = weighted_average(kspace + pred, sx)
        tc = jnp.fft.ifftn(lax.complex(dr, di), axes=(-2, -1), norm="backward")
        krf, kif = weighted_average(
            p["wa_param"],
            kr.reshape(C, XY), ki.reshape(C, XY),
            pkr.reshape(C, XY), pki.reshape(C, XY),
            jnp.real(tc).reshape(C, XY), jnp.imag(tc).reshape(C, XY),
            srf, sif)
        kr, ki = krf.reshape(C, X, Y), kif.reshape(C, X, Y)

    return jnp.stack([kr, ki], axis=-1)[None]


def init_params(key, num_cascades, in_ch=2, hidden=8, n_convs=3):
    params = []
    for _ in range(num_cascades):
        w_k, b_col, w_oihw, b_flat = [], [], [], []
        for l in range(n_convs):
            cin = in_ch if l == 0 else hidden
            cout = hidden if l != n_convs - 1 else in_ch
            key, kw, kb = jax.random.split(key, 3)
            w = jax.random.normal(kw, (cout, cin, 3, 3), jnp.float32) / jnp.sqrt(9.0 * cin)
            b = jax.random.normal(kb, (cout,), jnp.float32) * 0.01
            w_oihw.append(w)           # reference layout
            b_flat.append(b)
            # (Cout,Cin,3,3) -> (3,3,Cout,Cin) -> (9, Cout, Cin), k = kx*3+ky
            w_k.append(jnp.transpose(w, (2, 3, 0, 1)).reshape(9, cout, cin))
            b_col.append(b[:, None])
        params.append(dict(
            conv_w_k=w_k, conv_b_col=b_col,
            conv_w_oihw=w_oihw, conv_b=b_flat,
            prelu_a=jnp.array([0.25], jnp.float32),
            dc_lambda=jnp.array([0.8], jnp.float32),
            wa_param=jnp.array([0.6], jnp.float32),
        ))
    return params


# ---------------------------------------------------------------------------
# Pure-JAX reference (mirrors the torch semantics) for a correctness check
# ---------------------------------------------------------------------------
def reference_forward(kspace, sens, mask, params):
    def cmul(x, y):
        re = x[..., 0] * y[..., 0] - x[..., 1] * y[..., 1]
        im = x[..., 0] * y[..., 1] + x[..., 1] * y[..., 0]
        return jnp.stack((re, im), axis=-1)

    def cconj(x):
        return jnp.stack((x[..., 0], -x[..., 1]), axis=-1)

    def fft2(x):
        yc = jnp.fft.fftn(lax.complex(x[..., 0], x[..., 1]), axes=(-2, -1), norm="backward")
        return jnp.stack((jnp.real(yc), jnp.imag(yc)), axis=-1)

    def ifft2(x):
        yc = jnp.fft.ifftn(lax.complex(x[..., 0], x[..., 1]), axes=(-2, -1), norm="backward")
        return jnp.stack((jnp.real(yc), jnp.imag(yc)), axis=-1)

    mb = mask.astype(bool)
    for p in params:
        pred = cmul(ifft2(kspace), cconj(sens)).sum(axis=1)
        x = jnp.transpose(pred, (0, 3, 1, 2))
        n = len(p["conv_w_oihw"])
        for l in range(n):
            x = lax.conv_general_dilated(
                x, p["conv_w_oihw"][l], (1, 1), "SAME",
                dimension_numbers=("NCHW", "OIHW", "NCHW"),
                precision=lax.Precision.HIGHEST,
            ) + p["conv_b"][l][None, :, None, None]
            if l != n - 1:
                x = jnp.where(x >= 0.0, x, p["prelu_a"][0] * x)
        pred = jnp.transpose(x, (0, 2, 3, 1))
        pred = fft2(cmul(pred, sens))
        sx = jnp.where(mb, pred - kspace, 0.0) * p["dc_lambda"][0]
        sx = cmul(ifft2(sx), cconj(sens)).sum(axis=1)
        kspace = p["wa_param"][0] * (kspace + pred) + (1.0 - p["wa_param"][0]) * sx
    return kspace


if __name__ == "__main__":
    B, C, X, Y = 1, 4, 16, 16
    num_cascades = 2

    key = jax.random.PRNGKey(0)
    kk, ks, km, kp = jax.random.split(key, 4)
    kspace = jax.random.normal(kk, (B, C, X, Y, 2), jnp.float32)
    sens = jax.random.normal(ks, (B, C, X, Y, 2), jnp.float32) * 0.5
    mask_line = (jax.random.uniform(km, (Y,)) > 0.5).astype(jnp.float32)
    mask = jnp.asarray(jnp.broadcast_to(mask_line[None, None, None, :, None],
                                        (1, 1, X, Y, 1)))
    params = init_params(kp, num_cascades)

    out = jax.jit(vsnet_block_forward)(kspace, sens, mask, params)
    out = jax.block_until_ready(out)

    ref = jax.jit(reference_forward)(kspace, sens, mask, params)
    ref = jax.block_until_ready(ref)

    assert out.shape == (B, C, X, Y, 2)
    scale = float(jnp.max(jnp.abs(ref))) + 1e-6
    max_err = float(jnp.max(jnp.abs(out - ref)))
    # Tolerance accounts for MXU matmul accumulation order / precision vs the
    # HIGHEST-precision XLA conv reference; structural bugs give O(1) errors.
    assert max_err <= 2e-2 * scale, f"mismatch: max_err={max_err}, scale={scale}"

    print("KERNEL_OK")
</pallas_src>

<mosaic_0001>
module attributes {stable_mosaic.version = 11 : i64} {
  func.func @_image_chain_kernel(%arg0: memref<4x324xf32, #tpu.memory_space<vmem>>, %arg1: memref<4x324xf32, #tpu.memory_space<vmem>>, %arg2: memref<4x324xf32, #tpu.memory_space<vmem>>, %arg3: memref<4x324xf32, #tpu.memory_space<vmem>>, %arg4: memref<9x8x2xf32, #tpu.memory_space<vmem>>, %arg5: memref<8x1xf32, #tpu.memory_space<vmem>>, %arg6: memref<9x8x8xf32, #tpu.memory_space<vmem>>, %arg7: memref<8x1xf32, #tpu.memory_space<vmem>>, %arg8: memref<9x2x8xf32, #tpu.memory_space<vmem>>, %arg9: memref<2x1xf32, #tpu.memory_space<vmem>>, %arg10: memref<1xf32, #tpu.memory_space<smem>>, %arg11: memref<4x288xf32, #tpu.memory_space<vmem>>, %arg12: memref<4x288xf32, #tpu.memory_space<vmem>>, %arg13: memref<8x342xf32, #tpu.memory_space<vmem>>) attributes {dimension_semantics = [], scalar_prefetch = 0 : i64, scratch_operands = 1 : i64, tpu.core_type = #tpu.core_type<tc>} {
    %c0 = arith.constant 0 : index
    %c0_0 = arith.constant 0 : index
    %0 = vector.load %arg2[%c0, %c0_0] : memref<4x324xf32, #tpu.memory_space<vmem>>, vector<4x324xf32>
    %c0_1 = arith.constant 0 : index
    %c0_2 = arith.constant 0 : index
    %1 = vector.load %arg3[%c0_1, %c0_2] : memref<4x324xf32, #tpu.memory_space<vmem>>, vector<4x324xf32>
    %c0_3 = arith.constant 0 : index
    %c0_4 = arith.constant 0 : index
    %2 = vector.load %arg0[%c0_3, %c0_4] : memref<4x324xf32, #tpu.memory_space<vmem>>, vector<4x324xf32>
    %c0_5 = arith.constant 0 : index
    %c0_6 = arith.constant 0 : index
    %3 = vector.load %arg1[%c0_5, %c0_6] : memref<4x324xf32, #tpu.memory_space<vmem>>, vector<4x324xf32>
    %4 = arith.mulf %2, %0 : vector<4x324xf32>
    %5 = arith.mulf %3, %1 : vector<4x324xf32>
    %6 = arith.addf %4, %5 : vector<4x324xf32>
    %cst = arith.constant dense<0.000000e+00> : vector<324xf32>
    %7 = vector.multi_reduction <add>, %6, %cst [0] : vector<4x324xf32> to vector<324xf32>
    %8 = vector.shape_cast %7 : vector<324xf32> to vector<1x324xf32>
    %9 = arith.mulf %3, %0 : vector<4x324xf32>
    %10 = arith.mulf %2, %1 : vector<4x324xf32>
    %11 = arith.subf %9, %10 : vector<4x324xf32>
    %cst_7 = arith.constant dense<0.000000e+00> : vector<324xf32>
    %12 = vector.multi_reduction <add>, %11, %cst_7 [0] : vector<4x324xf32> to vector<324xf32>
    %13 = vector.shape_cast %12 : vector<324xf32> to vector<1x324xf32>
    %cst_8 = arith.constant 0.000000e+00 : f32
    %14 = vector.broadcast %cst_8 : f32 to vector<8x342xf32>
    %c0_9 = arith.constant 0 : index
    %c0_10 = arith.constant 0 : index
    %15 = vector.load %arg13[%c0_9, %c0_10] : memref<8x342xf32, #tpu.memory_space<vmem>>, vector<8x342xf32>
    tpu.vector_store %arg13[%c0_9, %c0_10], %14 {strides = array<i32>} : memref<8x342xf32, #tpu.memory_space<vmem>>, vector<8x342xf32>,
    %c0_11 = arith.constant 0 : index
    %c0_12 = arith.constant 0 : index
    %16 = vector.load %arg13[%c0_11, %c0_12] : memref<8x342xf32, #tpu.memory_space<vmem>>, vector<1x324xf32>
    tpu.vector_store %arg13[%c0_11, %c0_12], %8 {strides = array<i32>} : memref<8x342xf32, #tpu.memory_space<vmem>>, vector<1x324xf32>,
    %c1 = arith.constant 1 : index
    %c0_13 = arith.constant 0 : index
    %17 = vector.load %arg13[%c1, %c0_13] : memref<8x342xf32, #tpu.memory_space<vmem>>, vector<1x324xf32>
    tpu.vector_store %arg13[%c1, %c0_13], %13 {strides = array<i32>} : memref<8x342xf32, #tpu.memory_space<vmem>>, vector<1x324xf32>,
    %18 = tpu.iota {dimensions = array<i32: 1>} : vector<1x288xi32>
    %c18_i32 = arith.constant 18 : i32
    %c0_i32 = arith.constant 0 : i32
    %19 = arith.cmpi eq, %c18_i32, %c0_i32 : i32
    %c1_i32 = arith.constant 1 : i32
    %20 = arith.select %19, %c1_i32, %c18_i32 : i32
    %21 = vector.broadcast %20 : i32 to vector<1x288xi32>
    %22 = arith.remsi %18, %21 : vector<1x288xi32>
    %c0_i32_14 = arith.constant 0 : i32
    %23 = vector.broadcast %c0_i32_14 : i32 to vector<1x288xi32>
    %24 = arith.cmpi ne, %22, %23 : vector<1x288xi32>
    %c0_i32_15 = arith.constant 0 : i32
    %25 = vector.broadcast %c0_i32_15 : i32 to vector<1x288xi32>
    %26 = arith.cmpi slt, %22, %25 : vector<1x288xi32>
    %c0_i32_16 = arith.constant 0 : i32
    %27 = arith.cmpi slt, %20, %c0_i32_16 : i32
    %28 = vector.broadcast %27 : i1 to vector<1x288xi1>
    %29 = vector.broadcast %28 : vector<1x288xi1> to vector<1x288xi1>
    %30 = arith.xori %26, %29 : vector<1x288xi1>
    %31 = arith.andi %30, %24 : vector<1x288xi1>
    %32 = vector.broadcast %20 : i32 to vector<1x288xi32>
    %33 = arith.addi %22, %32 : vector<1x288xi32>
    %34 = arith.select %31, %33, %22 : vector<1x288xi1>, vector<1x288xi32>
    %c16_i32 = arith.constant 16 : i32
    %35 = vector.broadcast %c16_i32 : i32 to vector<1x288xi32>
    %36 = arith.cmpi slt, %34, %35 : vector<1x288xi32>
    %c0_17 = arith.constant 0 : index
    %c0_18 = arith.constant 0 : index
    %37 = vector.load %arg13[%c0_17, %c0_18] : memref<8x342xf32, #tpu.memory_space<vmem>>, vector<2x288xf32>
    %c0_19 = arith.constant 0 : index
    %c0_20 = arith.constant 0 : index
    %c0_21 = arith.constant 0 : index
    %38 = vector.load %arg4[%c0_19, %c0_20, %c0_21] : memref<9x8x2xf32, #tpu.memory_space<vmem>>, vector<1x8x2xf32>
    %39 = vector.shape_cast %38 : vector<1x8x2xf32> to vector<8x2xf32>
    %cst_22 = arith.constant dense<0.000000e+00> : vector<8x288xf32>
    %40 = tpu.matmul %39, %37, %cst_22 {dimension_numbers = #tpu.dot_dimension_numbers<[1], [0], [0], [1], [0, 0, 1, 1], [], []>} : vector<8x2xf32>, vector<2x288xf32>, vector<8x288xf32> -> vector<8x288xf32>
    %c0_23 = arith.constant 0 : index
    %c1_24 = arith.constant 1 : index
    %41 = vector.load %arg13[%c0_23, %c1_24] : memref<8x342xf32, #tpu.memory_space<vmem>>, vector<2x288xf32>
    %c1_25 = arith.constant 1 : index
    %c0_26 = arith.constant 0 : index
    %c0_27 = arith.constant 0 : index
    %42 = vector.load %arg4[%c1_25, %c0_26, %c0_27] : memref<9x8x2xf32, #tpu.memory_space<vmem>>, vector<1x8x2xf32>
    %43 = vector.shape_cast %42 : vector<1x8x2xf32> to vector<8x2xf32>
    %cst_28 = arith.constant dense<0.000000e+00> : vector<8x288xf32>
    %44 = tpu.matmul %43, %41, %cst_28 {dimension_numbers = #tpu.dot_dimension_numbers<[1], [0], [0], [1], [0, 0, 1, 1], [], []>} : vector<8x2xf32>, vector<2x288xf32>, vector<8x288xf32> -> vector<8x288xf32>
    %45 = arith.addf %40, %44 : vector<8x288xf32>
    %c0_29 = arith.constant 0 : index
    %c2 = arith.constant 2 : index
    %46 = vector.load %arg13[%c0_29, %c2] : memref<8x342xf32, #tpu.memory_space<vmem>>, vector<2x288xf32>
    %c2_30 = arith.constant 2 : index
    %c0_31 = arith.constant 0 : index
    %c0_32 = arith.constant 0 : index
    %47 = vector.load %arg4[%c2_30, %c0_31, %c0_32] : memref<9x8x2xf32, #tpu.memory_space<vmem>>, vector<1x8x2xf32>
    %48 = vector.shape_cast %47 : vector<1x8x2xf32> to vector<8x2xf32>
    %cst_33 = arith.constant dense<0.000000e+00> : vector<8x288xf32>
    %49 = tpu.matmul %48, %46, %cst_33 {dimension_numbers = #tpu.dot_dimension_numbers<[1], [0], [0], [1], [0, 0, 1, 1], [], []>} : vector<8x2xf32>, vector<2x288xf32>, vector<8x288xf32> -> vector<8x288xf32>
    %50 = arith.addf %45, %49 : vector<8x288xf32>
    %c0_34 = arith.constant 0 : index
    %c18 = arith.constant 18 : index
    %51 = vector.load %arg13[%c0_34, %c18] : memref<8x342xf32, #tpu.memory_space<vmem>>, vector<2x288xf32>
    %c3 = arith.constant 3 : index
    %c0_35 = arith.constant 0 : index
    %c0_36 = arith.constant 0 : index
    %52 = vector.load %arg4[%c3, %c0_35, %c0_36] : memref<9x8x2xf32, #tpu.memory_space<vmem>>, vector<1x8x2xf32>
    %53 = vector.shape_cast %52 : vector<1x8x2xf32> to vector<8x2xf32>
    %cst_37 = arith.constant dense<0.000000e+00> : vector<8x288xf32>
    %54 = tpu.matmul %53, %51, %cst_37 {dimension_numbers = #tpu.dot_dimension_numbers<[1], [0], [0], [1], [0, 0, 1, 1], [], []>} : vector<8x2xf32>, vector<2x288xf32>, vector<8x288xf32> -> vector<8x288xf32>
    %55 = arith.addf %50, %54 : vector<8x288xf32>
    %c0_38 = arith.constant 0 : index
    %c19 = arith.constant 19 : index
    %56 = vector.load %arg13[%c0_38, %c19] : memref<8x342xf32, #tpu.memory_space<vmem>>, vector<2x288xf32>
    %c4 = arith.constant 4 : index
    %c0_39 = arith.constant 0 : index
    %c0_40 = arith.constant 0 : index
    %57 = vector.load %arg4[%c4, %c0_39, %c0_40] : memref<9x8x2xf32, #tpu.memory_space<vmem>>, vector<1x8x2xf32>
    %58 = vector.shape_cast %57 : vector<1x8x2xf32> to vector<8x2xf32>
    %cst_41 = arith.constant dense<0.000000e+00> : vector<8x288xf32>
    %59 = tpu.matmul %58, %56, %cst_41 {dimension_numbers = #tpu.dot_dimension_numbers<[1], [0], [0], [1], [0, 0, 1, 1], [], []>} : vector<8x2xf32>, vector<2x288xf32>, vector<8x288xf32> -> vector<8x288xf32>
    %60 = arith.addf %55, %59 : vector<8x288xf32>
    %c0_42 = arith.constant 0 : index
    %c20 = arith.constant 20 : index
    %61 = vector.load %arg13[%c0_42, %c20] : memref<8x342xf32, #tpu.memory_space<vmem>>, vector<2x288xf32>
    %c5 = arith.constant 5 : index
    %c0_43 = arith.constant 0 : index
    %c0_44 = arith.constant 0 : index
    %62 = vector.load %arg4[%c5, %c0_43, %c0_44] : memref<9x8x2xf32, #tpu.memory_space<vmem>>, vector<1x8x2xf32>
    %63 = vector.shape_cast %62 : vector<1x8x2xf32> to vector<8x2xf32>
    %cst_45 = arith.constant dense<0.000000e+00> : vector<8x288xf32>
    %64 = tpu.matmul %63, %61, %cst_45 {dimension_numbers = #tpu.dot_dimension_numbers<[1], [0], [0], [1], [0, 0, 1, 1], [], []>} : vector<8x2xf32>, vector<2x288xf32>, vector<8x288xf32> -> vector<8x288xf32>
    %65 = arith.addf %60, %64 : vector<8x288xf32>
    %c0_46 = arith.constant 0 : index
    %c36 = arith.constant 36 : index
    %66 = vector.load %arg13[%c0_46, %c36] : memref<8x342xf32, #tpu.memory_space<vmem>>, vector<2x288xf32>
    %c6 = arith.constant 6 : index
    %c0_47 = arith.constant 0 : index
    %c0_48 = arith.constant 0 : index
    %67 = vector.load %arg4[%c6, %c0_47, %c0_48] : memref<9x8x2xf32, #tpu.memory_space<vmem>>, vector<1x8x2xf32>
    %68 = vector.shape_cast %67 : vector<1x8x2xf32> to vector<8x2xf32>
    %cst_49 = arith.constant dense<0.000000e+00> : vector<8x288xf32>
    %69 = tpu.matmul %68, %66, %cst_49 {dimension_numbers = #tpu.dot_dimension_numbers<[1], [0], [0], [1], [0, 0, 1, 1], [], []>} : vector<8x2xf32>, vector<2x288xf32>, vector<8x288xf32> -> vector<8x288xf32>
    %70 = arith.addf %65, %69 : vector<8x288xf32>
    %c0_50 = arith.constant 0 : index
    %c37 = arith.constant 37 : index
    %71 = vector.load %arg13[%c0_50, %c37] : memref<8x342xf32, #tpu.memory_space<vmem>>, vector<2x288xf32>
    %c7 = arith.constant 7 : index
    %c0_51 = arith.constant 0 : index
    %c0_52 = arith.constant 0 : index
    %72 = vector.load %arg4[%c7, %c0_51, %c0_52] : memref<9x8x2xf32, #tpu.memory_space<vmem>>, vector<1x8x2xf32>
    %73 = vector.shape_cast %72 : vector<1x8x2xf32> to vector<8x2xf32>
    %cst_53 = arith.constant dense<0.000000e+00> : vector<8x288xf32>
    %74 = tpu.matmul %73, %71, %cst_53 {dimension_numbers = #tpu.dot_dimension_numbers<[1], [0], [0], [1], [0, 0, 1, 1], [], []>} : vector<8x2xf32>, vector<2x288xf32>, vector<8x288xf32> -> vector<8x288xf32>
    %75 = arith.addf %70, %74 : vector<8x288xf32>
    %c0_54 = arith.constant 0 : index
    %c38 = arith.constant 38 : index
    %76 = vector.load %arg13[%c0_54, %c38] : memref<8x342xf32, #tpu.memory_space<vmem>>, vector<2x288xf32>
    %c8 = arith.constant 8 : index
    %c0_55 = arith.constant 0 : index
    %c0_56 = arith.constant 0 : index
    %77 = vector.load %arg4[%c8, %c0_55, %c0_56] : memref<9x8x2xf32, #tpu.memory_space<vmem>>, vector<1x8x2xf32>
    %78 = vector.shape_cast %77 : vector<1x8x2xf32> to vector<8x2xf32>
    %cst_57 = arith.constant dense<0.000000e+00> : vector<8x288xf32>
    %79 = tpu.matmul %78, %76, %cst_57 {dimension_numbers = #tpu.dot_dimension_numbers<[1], [0], [0], [1], [0, 0, 1, 1], [], []>} : vector<8x2xf32>, vector<2x288xf32>, vector<8x288xf32> -> vector<8x288xf32>
    %80 = arith.addf %75, %79 : vector<8x288xf32>
    %c0_58 = arith.constant 0 : index
    %c0_59 = arith.constant 0 : index
    %81 = vector.load %arg5[%c0_58, %c0_59] : memref<8x1xf32, #tpu.memory_space<vmem>>, vector<8x1xf32>
    %82 = vector.broadcast %81 : vector<8x1xf32> to vector<8x288xf32>
    %83 = arith.addf %80, %82 : vector<8x288xf32>
    %cst_60 = arith.constant 0.000000e+00 : f32
    %84 = vector.broadcast %cst_60 : f32 to vector<8x288xf32>
    %85 = arith.cmpf oge, %83, %84 : vector<8x288xf32>
    %c0_61 = arith.constant 0 : index
    %86 = memref.load %arg10[%c0_61] : memref<1xf32, #tpu.memory_space<smem>>
    %87 = vector.broadcast %86 : f32 to vector<8x288xf32>
    %88 = arith.mulf %87, %83 : vector<8x288xf32>
    %89 = arith.select %85, %83, %88 : vector<8x288xi1>, vector<8x288xf32>
    %cst_62 = arith.constant 0.000000e+00 : f32
    %90 = vector.shape_cast %36 : vector<1x288xi1> to vector<1x288xi1>
    %91 = vector.broadcast %90 : vector<1x288xi1> to vector<8x288xi1>
    %92 = vector.broadcast %cst_62 : f32 to vector<8x288xf32>
    %93 = arith.select %91, %89, %92 : vector<8x288xi1>, vector<8x288xf32>
    %c0_63 = arith.constant 0 : index
    %c19_64 = arith.constant 19 : index
    %94 = vector.load %arg13[%c0_63, %c19_64] : memref<8x342xf32, #tpu.memory_space<vmem>>, vector<8x288xf32>
    tpu.vector_store %arg13[%c0_63, %c19_64], %93 {strides = array<i32>} : memref<8x342xf32, #tpu.memory_space<vmem>>, vector<8x288xf32>,
    %c0_65 = arith.constant 0 : index
    %c0_66 = arith.constant 0 : index
    %95 = vector.load %arg13[%c0_65, %c0_66] : memref<8x342xf32, #tpu.memory_space<vmem>>, vector<8x288xf32>
    %c0_67 = arith.constant 0 : index
    %c0_68 = arith.constant 0 : index
    %c0_69 = arith.constant 0 : index
    %96 = vector.load %arg6[%c0_67, %c0_68, %c0_69] : memref<9x8x8xf32, #tpu.memory_space<vmem>>, vector<1x8x8xf32>
    %97 = vector.shape_cast %96 : vector<1x8x8xf32> to vector<8x8xf32>
    %cst_70 = arith.constant dense<0.000000e+00> : vector<8x288xf32>
    %98 = tpu.matmul %97, %95, %cst_70 {dimension_numbers = #tpu.dot_dimension_numbers<[1], [0], [0], [1], [0, 0, 1, 1], [], []>} : vector<8x8xf32>, vector<8x288xf32>, vector<8x288xf32> -> vector<8x288xf32>
    %c0_71 = arith.constant 0 : index
    %c1_72 = arith.constant 1 : index
    %99 = vector.load %arg13[%c0_71, %c1_72] : memref<8x342xf32, #tpu.memory_space<vmem>>, vector<8x288xf32>
    %c1_73 = arith.constant 1 : index
    %c0_74 = arith.constant 0 : index
    %c0_75 = arith.constant 0 : index
    %100 = vector.load %arg6[%c1_73, %c0_74, %c0_75] : memref<9x8x8xf32, #tpu.memory_space<vmem>>, vector<1x8x8xf32>
    %101 = vector.shape_cast %100 : vector<1x8x8xf32> to vector<8x8xf32>
    %cst_76 = arith.constant dense<0.000000e+00> : vector<8x288xf32>
    %102 = tpu.matmul %101, %99, %cst_76 {dimension_numbers = #tpu.dot_dimension_numbers<[1], [0], [0], [1], [0, 0, 1, 1], [], []>} : vector<8x8xf32>, vector<8x288xf32>, vector<8x288xf32> -> vector<8x288xf32>
    %103 = arith.addf %98, %102 : vector<8x288xf32>
    %c0_77 = arith.constant 0 : index
    %c2_78 = arith.constant 2 : index
    %104 = vector.load %arg13[%c0_77, %c2_78] : memref<8x342xf32, #tpu.memory_space<vmem>>, vector<8x288xf32>
    %c2_79 = arith.constant 2 : index
    %c0_80 = arith.constant 0 : index
    %c0_81 = arith.constant 0 : index
    %105 = vector.load %arg6[%c2_79, %c0_80, %c0_81] : memref<9x8x8xf32, #tpu.memory_space<vmem>>, vector<1x8x8xf32>
    %106 = vector.shape_cast %105 : vector<1x8x8xf32> to vector<8x8xf32>
    %cst_82 = arith.constant dense<0.000000e+00> : vector<8x288xf32>
    %107 = tpu.matmul %106, %104, %cst_82 {dimension_numbers = #tpu.dot_dimension_numbers<[1], [0], [0], [1], [0, 0, 1, 1], [], []>} : vector<8x8xf32>, vector<8x288xf32>, vector<8x288xf32> -> vector<8x288xf32>
    %108 = arith.addf %103, %107 : vector<8x288xf32>
    %c0_83 = arith.constant 0 : index
    %c18_84 = arith.constant 18 : index
    %109 = vector.load %arg13[%c0_83, %c18_84] : memref<8x342xf32, #tpu.memory_space<vmem>>, vector<8x288xf32>
    %c3_85 = arith.constant 3 : index
    %c0_86 = arith.constant 0 : index
    %c0_87 = arith.constant 0 : index
    %110 = vector.load %arg6[%c3_85, %c0_86, %c0_87] : memref<9x8x8xf32, #tpu.memory_space<vmem>>, vector<1x8x8xf32>
    %111 = vector.shape_cast %110 : vector<1x8x8xf32> to vector<8x8xf32>
    %cst_88 = arith.constant dense<0.000000e+00> : vector<8x288xf32>
    %112 = tpu.matmul %111, %109, %cst_88 {dimension_numbers = #tpu.dot_dimension_numbers<[1], [0], [0], [1], [0, 0, 1, 1], [], []>} : vector<8x8xf32>, vector<8x288xf32>, vector<8x288xf32> -> vector<8x288xf32>
    %113 = arith.addf %108, %112 : vector<8x288xf32>
    %c0_89 = arith.constant 0 : index
    %c19_90 = arith.constant 19 : index
    %114 = vector.load %arg13[%c0_89, %c19_90] : memref<8x342xf32, #tpu.memory_space<vmem>>, vector<8x288xf32>
    %c4_91 = arith.constant 4 : index
    %c0_92 = arith.constant 0 : index
    %c0_93 = arith.constant 0 : index
    %115 = vector.load %arg6[%c4_91, %c0_92, %c0_93] : memref<9x8x8xf32, #tpu.memory_space<vmem>>, vector<1x8x8xf32>
    %116 = vector.shape_cast %115 : vector<1x8x8xf32> to vector<8x8xf32>
    %cst_94 = arith.constant dense<0.000000e+00> : vector<8x288xf32>
    %117 = tpu.matmul %116, %114, %cst_94 {dimension_numbers = #tpu.dot_dimension_numbers<[1], [0], [0], [1], [0, 0, 1, 1], [], []>} : vector<8x8xf32>, vector<8x288xf32>, vector<8x288xf32> -> vector<8x288xf32>
    %118 = arith.addf %113, %117 : vector<8x288xf32>
    %c0_95 = arith.constant 0 : index
    %c20_96 = arith.constant 20 : index
    %119 = vector.load %arg13[%c0_95, %c20_96] : memref<8x342xf32, #tpu.memory_space<vmem>>, vector<8x288xf32>
    %c5_97 = arith.constant 5 : index
    %c0_98 = arith.constant 0 : index
    %c0_99 = arith.constant 0 : index
    %120 = vector.load %arg6[%c5_97, %c0_98, %c0_99] : memref<9x8x8xf32, #tpu.memory_space<vmem>>, vector<1x8x8xf32>
    %121 = vector.shape_cast %120 : vector<1x8x8xf32> to vector<8x8xf32>
    %cst_100 = arith.constant dense<0.000000e+00> : vector<8x288xf32>
    %122 = tpu.matmul %121, %119, %cst_100 {dimension_numbers = #tpu.dot_dimension_numbers<[1], [0], [0], [1], [0, 0, 1, 1], [], []>} : vector<8x8xf32>, vector<8x288xf32>, vector<8x288xf32> -> vector<8x288xf32>
    %123 = arith.addf %118, %122 : vector<8x288xf32>
    %c0_101 = arith.constant 0 : index
    %c36_102 = arith.constant 36 : index
    %124 = vector.load %arg13[%c0_101, %c36_102] : memref<8x342xf32, #tpu.memory_space<vmem>>, vector<8x288xf32>
    %c6_103 = arith.constant 6 : index
    %c0_104 = arith.constant 0 : index
    %c0_105 = arith.constant 0 : index
    %125 = vector.load %arg6[%c6_103, %c0_104, %c0_105] : memref<9x8x8xf32, #tpu.memory_space<vmem>>, vector<1x8x8xf32>
    %126 = vector.shape_cast %125 : vector<1x8x8xf32> to vector<8x8xf32>
    %cst_106 = arith.constant dense<0.000000e+00> : vector<8x288xf32>
    %127 = tpu.matmul %126, %124, %cst_106 {dimension_numbers = #tpu.dot_dimension_numbers<[1], [0], [0], [1], [0, 0, 1, 1], [], []>} : vector<8x8xf32>, vector<8x288xf32>, vector<8x288xf32> -> vector<8x288xf32>
    %128 = arith.addf %123, %127 : vector<8x288xf32>
    %c0_107 = arith.constant 0 : index
    %c37_108 = arith.constant 37 : index
    %129 = vector.load %arg13[%c0_107, %c37_108] : memref<8x342xf32, #tpu.memory_space<vmem>>, vector<8x288xf32>
    %c7_109 = arith.constant 7 : index
    %c0_110 = arith.constant 0 : index
    %c0_111 = arith.constant 0 : index
    %130 = vector.load %arg6[%c7_109, %c0_110, %c0_111] : memref<9x8x8xf32, #tpu.memory_space<vmem>>, vector<1x8x8xf32>
    %131 = vector.shape_cast %130 : vector<1x8x8xf32> to vector<8x8xf32>
    %cst_112 = arith.constant dense<0.000000e+00> : vector<8x288xf32>
    %132 = tpu.matmul %131, %129, %cst_112 {dimension_numbers = #tpu.dot_dimension_numbers<[1], [0], [0], [1], [0, 0, 1, 1], [], []>} : vector<8x8xf32>, vector<8x288xf32>, vector<8x288xf32> -> vector<8x288xf32>
    %133 = arith.addf %128, %132 : vector<8x288xf32>
    %c0_113 = arith.constant 0 : index
    %c38_114 = arith.constant 38 : index
    %134 = vector.load %arg13[%c0_113, %c38_114] : memref<8x342xf32, #tpu.memory_space<vmem>>, vector<8x288xf32>
    %c8_115 = arith.constant 8 : index
    %c0_116 = arith.constant 0 : index
    %c0_117 = arith.constant 0 : index
    %135 = vector.load %arg6[%c8_115, %c0_116, %c0_117] : memref<9x8x8xf32, #tpu.memory_space<vmem>>, vector<1x8x8xf32>
    %136 = vector.shape_cast %135 : vector<1x8x8xf32> to vector<8x8xf32>
    %cst_118 = arith.constant dense<0.000000e+00> : vector<8x288xf32>
    %137 = tpu.matmul %136, %134, %cst_118 {dimension_numbers = #tpu.dot_dimension_numbers<[1], [0], [0], [1], [0, 0, 1, 1], [], []>} : vector<8x8xf32>, vector<8x288xf32>, vector<8x288xf32> -> vector<8x288xf32>
    %138 = arith.addf %133, %137 : vector<8x288xf32>
    %c0_119 = arith.constant 0 : index
    %c0_120 = arith.constant 0 : index
    %139 = vector.load %arg7[%c0_119, %c0_120] : memref<8x1xf32, #tpu.memory_space<vmem>>, vector<8x1xf32>
    %140 = vector.broadcast %139 : vector<8x1xf32> to vector<8x288xf32>
    %141 = arith.addf %138, %140 : vector<8x288xf32>
    %cst_121 = arith.constant 0.000000e+00 : f32
    %142 = vector.broadcast %cst_121 : f32 to vector<8x288xf32>
    %143 = arith.cmpf oge, %141, %142 : vector<8x288xf32>
    %c0_122 = arith.constant 0 : index
    %144 = memref.load %arg10[%c0_122] : memref<1xf32, #tpu.memory_space<smem>>
    %145 = vector.broadcast %144 : f32 to vector<8x288xf32>
    %146 = arith.mulf %145, %141 : vector<8x288xf32>
    %147 = arith.select %143, %141, %146 : vector<8x288xi1>, vector<8x288xf32>
    %cst_123 = arith.constant 0.000000e+00 : f32
    %148 = vector.shape_cast %36 : vector<1x288xi1> to vector<1x288xi1>
    %149 = vector.broadcast %148 : vector<1x288xi1> to vector<8x288xi1>
    %150 = vector.broadcast %cst_123 : f32 to vector<8x288xf32>
    %151 = arith.select %149, %147, %150 : vector<8x288xi1>, vector<8x288xf32>
    %c0_124 = arith.constant 0 : index
    %c19_125 = arith.constant 19 : index
    %152 = vector.load %arg13[%c0_124, %c19_125] : memref<8x342xf32, #tpu.memory_space<vmem>>, vector<8x288xf32>
    tpu.vector_store %arg13[%c0_124, %c19_125], %151 {strides = array<i32>} : memref<8x342xf32, #tpu.memory_space<vmem>>, vector<8x288xf32>,
    %c0_126 = arith.constant 0 : index
    %c0_127 = arith.constant 0 : index
    %153 = vector.load %arg13[%c0_126, %c0_127] : memref<8x342xf32, #tpu.memory_space<vmem>>, vector<8x288xf32>
    %c0_128 = arith.constant 0 : index
    %c0_129 = arith.constant 0 : index
    %c0_130 = arith.constant 0 : index
    %154 = vector.load %arg8[%c0_128, %c0_129, %c0_130] : memref<9x2x8xf32, #tpu.memory_space<vmem>>, vector<1x2x8xf32>
    %155 = vector.shape_cast %154 : vector<1x2x8xf32> to vector<2x8xf32>
    %cst_131 = arith.constant dense<0.000000e+00> : vector<2x288xf32>
    %156 = tpu.matmul %155, %153, %cst_131 {dimension_numbers = #tpu.dot_dimension_numbers<[1], [0], [0], [1], [0, 0, 1, 1], [], []>} : vector<2x8xf32>, vector<8x288xf32>, vector<2x288xf32> -> vector<2x288xf32>
    %c0_132 = arith.constant 0 : index
    %c1_133 = arith.constant 1 : index
    %157 = vector.load %arg13[%c0_132, %c1_133] : memref<8x342xf32, #tpu.memory_space<vmem>>, vector<8x288xf32>
    %c1_134 = arith.constant 1 : index
    %c0_135 = arith.constant 0 : index
    %c0_136 = arith.constant 0 : index
    %158 = vector.load %arg8[%c1_134, %c0_135, %c0_136] : memref<9x2x8xf32, #tpu.memory_space<vmem>>, vector<1x2x8xf32>
    %159 = vector.shape_cast %158 : vector<1x2x8xf32> to vector<2x8xf32>
    %cst_137 = arith.constant dense<0.000000e+00> : vector<2x288xf32>
    %160 = tpu.matmul %159, %157, %cst_137 {dimension_numbers = #tpu.dot_dimension_numbers<[1], [0], [0], [1], [0, 0, 1, 1], [], []>} : vector<2x8xf32>, vector<8x288xf32>, vector<2x288xf32> -> vector<2x288xf32>
    %161 = arith.addf %156, %160 : vector<2x288xf32>
    %c0_138 = arith.constant 0 : index
    %c2_139 = arith.constant 2 : index
    %162 = vector.load %arg13[%c0_138, %c2_139] : memref<8x342xf32, #tpu.memory_space<vmem>>, vector<8x288xf32>
    %c2_140 = arith.constant 2 : index
    %c0_141 = arith.constant 0 : index
    %c0_142 = arith.constant 0 : index
    %163 = vector.load %arg8[%c2_140, %c0_141, %c0_142] : memref<9x2x8xf32, #tpu.memory_space<vmem>>, vector<1x2x8xf32>
    %164 = vector.shape_cast %163 : vector<1x2x8xf32> to vector<2x8xf32>
    %cst_143 = arith.constant dense<0.000000e+00> : vector<2x288xf32>
    %165 = tpu.matmul %164, %162, %cst_143 {dimension_numbers = #tpu.dot_dimension_numbers<[1], [0], [0], [1], [0, 0, 1, 1], [], []>} : vector<2x8xf32>, vector<8x288xf32>, vector<2x288xf32> -> vector<2x288xf32>
    %166 = arith.addf %161, %165 : vector<2x288xf32>
    %c0_144 = arith.constant 0 : index
    %c18_145 = arith.constant 18 : index
    %167 = vector.load %arg13[%c0_144, %c18_145] : memref<8x342xf32, #tpu.memory_space<vmem>>, vector<8x288xf32>
    %c3_146 = arith.constant 3 : index
    %c0_147 = arith.constant 0 : index
    %c0_148 = arith.constant 0 : index
    %168 = vector.load %arg8[%c3_146, %c0_147, %c0_148] : memref<9x2x8xf32, #tpu.memory_space<vmem>>, vector<1x2x8xf32>
    %169 = vector.shape_cast %168 : vector<1x2x8xf32> to vector<2x8xf32>
    %cst_149 = arith.constant dense<0.000000e+00> : vector<2x288xf32>
    %170 = tpu.matmul %169, %167, %cst_149 {dimension_numbers = #tpu.dot_dimension_numbers<[1], [0], [0], [1], [0, 0, 1, 1], [], []>} : vector<2x8xf32>, vector<8x288xf32>, vector<2x288xf32> -> vector<2x288xf32>
    %171 = arith.addf %166, %170 : vector<2x288xf32>
    %c0_150 = arith.constant 0 : index
    %c19_151 = arith.constant 19 : index
    %172 = vector.load %arg13[%c0_150, %c19_151] : memref<8x342xf32, #tpu.memory_space<vmem>>, vector<8x288xf32>
    %c4_152 = arith.constant 4 : index
    %c0_153 = arith.constant 0 : index
    %c0_154 = arith.constant 0 : index
    %173 = vector.load %arg8[%c4_152, %c0_153, %c0_154] : memref<9x2x8xf32, #tpu.memory_space<vmem>>, vector<1x2x8xf32>
    %174 = vector.shape_cast %173 : vector<1x2x8xf32> to vector<2x8xf32>
    %cst_155 = arith.constant dense<0.000000e+00> : vector<2x288xf32>
    %175 = tpu.matmul %174, %172, %cst_155 {dimension_numbers = #tpu.dot_dimension_numbers<[1], [0], [0], [1], [0, 0, 1, 1], [], []>} : vector<2x8xf32>, vector<8x288xf32>, vector<2x288xf32> -> vector<2x288xf32>
    %176 = arith.addf %171, %175 : vector<2x288xf32>
    %c0_156 = arith.constant 0 : index
    %c20_157 = arith.constant 20 : index
    %177 = vector.load %arg13[%c0_156, %c20_157] : memref<8x342xf32, #tpu.memory_space<vmem>>, vector<8x288xf32>
    %c5_158 = arith.constant 5 : index
    %c0_159 = arith.constant 0 : index
    %c0_160 = arith.constant 0 : index
    %178 = vector.load %arg8[%c5_158, %c0_159, %c0_160] : memref<9x2x8xf32, #tpu.memory_space<vmem>>, vector<1x2x8xf32>
    %179 = vector.shape_cast %178 : vector<1x2x8xf32> to vector<2x8xf32>
    %cst_161 = arith.constant dense<0.000000e+00> : vector<2x288xf32>
    %180 = tpu.matmul %179, %177, %cst_161 {dimension_numbers = #tpu.dot_dimension_numbers<[1], [0], [0], [1], [0, 0, 1, 1], [], []>} : vector<2x8xf32>, vector<8x288xf32>, vector<2x288xf32> -> vector<2x288xf32>
    %181 = arith.addf %176, %180 : vector<2x288xf32>
    %c0_162 = arith.constant 0 : index
    %c36_163 = arith.constant 36 : index
    %182 = vector.load %arg13[%c0_162, %c36_163] : memref<8x342xf32, #tpu.memory_space<vmem>>, vector<8x288xf32>
    %c6_164 = arith.constant 6 : index
    %c0_165 = arith.constant 0 : index
    %c0_166 = arith.constant 0 : index
    %183 = vector.load %arg8[%c6_164, %c0_165, %c0_166] : memref<9x2x8xf32, #tpu.memory_space<vmem>>, vector<1x2x8xf32>
    %184 = vector.shape_cast %183 : vector<1x2x8xf32> to vector<2x8xf32>
    %cst_167 = arith.constant dense<0.000000e+00> : vector<2x288xf32>
    %185 = tpu.matmul %184, %182, %cst_167 {dimension_numbers = #tpu.dot_dimension_numbers<[1], [0], [0], [1], [0, 0, 1, 1], [], []>} : vector<2x8xf32>, vector<8x288xf32>, vector<2x288xf32> -> vector<2x288xf32>
    %186 = arith.addf %181, %185 : vector<2x288xf32>
    %c0_168 = arith.constant 0 : index
    %c37_169 = arith.constant 37 : index
    %187 = vector.load %arg13[%c0_168, %c37_169] : memref<8x342xf32, #tpu.memory_space<vmem>>, vector<8x288xf32>
    %c7_170 = arith.constant 7 : index
    %c0_171 = arith.constant 0 : index
    %c0_172 = arith.constant 0 : index
    %188 = vector.load %arg8[%c7_170, %c0_171, %c0_172] : memref<9x2x8xf32, #tpu.memory_space<vmem>>, vector<1x2x8xf32>
    %189 = vector.shape_cast %188 : vector<1x2x8xf32> to vector<2x8xf32>
    %cst_173 = arith.constant dense<0.000000e+00> : vector<2x288xf32>
    %190 = tpu.matmul %189, %187, %cst_173 {dimension_numbers = #tpu.dot_dimension_numbers<[1], [0], [0], [1], [0, 0, 1, 1], [], []>} : vector<2x8xf32>, vector<8x288xf32>, vector<2x288xf32> -> vector<2x288xf32>
    %191 = arith.addf %186, %190 : vector<2x288xf32>
    %c0_174 = arith.constant 0 : index
    %c38_175 = arith.constant 38 : index
    %192 = vector.load %arg13[%c0_174, %c38_175] : memref<8x342xf32, #tpu.memory_space<vmem>>, vector<8x288xf32>
    %c8_176 = arith.constant 8 : index
    %c0_177 = arith.constant 0 : index
    %c0_178 = arith.constant 0 : index
    %193 = vector.load %arg8[%c8_176, %c0_177, %c0_178] : memref<9x2x8xf32, #tpu.memory_space<vmem>>, vector<1x2x8xf32>
    %194 = vector.shape_cast %193 : vector<1x2x8xf32> to vector<2x8xf32>
    %cst_179 = arith.constant dense<0.000000e+00> : vector<2x288xf32>
    %195 = tpu.matmul %194, %192, %cst_179 {dimension_numbers = #tpu.dot_dimension_numbers<[1], [0], [0], [1], [0, 0, 1, 1], [], []>} : vector<2x8xf32>, vector<8x288xf32>, vector<2x288xf32> -> vector<2x288xf32>
    %196 = arith.addf %191, %195 : vector<2x288xf32>
    %c0_180 = arith.constant 0 : index
    %c0_181 = arith.constant 0 : index
    %197 = vector.load %arg9[%c0_180, %c0_181] : memref<2x1xf32, #tpu.memory_space<vmem>>, vector<2x1xf32>
    %198 = vector.broadcast %197 : vector<2x1xf32> to vector<2x288xf32>
    %199 = arith.addf %196, %198 : vector<2x288xf32>
    %200 = vector.extract_strided_slice %0 {offsets = [0, 19], sizes = [4, 288], strides = [1, 1]} : vector<4x324xf32> to vector<4x288xf32>
    %201 = vector.extract_strided_slice %1 {offsets = [0, 19], sizes = [4, 288], strides = [1, 1]} : vector<4x324xf32> to vector<4x288xf32>
    %202 = vector.extract_strided_slice %199 {offsets = [0, 0], sizes = [1, 288], strides = [1, 1]} : vector<2x288xf32> to vector<1x288xf32>
    %203 = vector.extract_strided_slice %199 {offsets = [1, 0], sizes = [1, 288], strides = [1, 1]} : vector<2x288xf32> to vector<1x288xf32>
    %204 = vector.broadcast %202 : vector<1x288xf32> to vector<4x288xf32>
    %205 = arith.mulf %204, %200 : vector<4x288xf32>
    %206 = vector.broadcast %203 : vector<1x288xf32> to vector<4x288xf32>
    %207 = arith.mulf %206, %201 : vector<4x288xf32>
    %208 = arith.subf %205, %207 : vector<4x288xf32>
    %c0_182 = arith.constant 0 : index
    %c0_183 = arith.constant 0 : index
    %209 = vector.load %arg11[%c0_182, %c0_183] : memref<4x288xf32, #tpu.memory_space<vmem>>, vector<4x288xf32>
    tpu.vector_store %arg11[%c0_182, %c0_183], %208 {strides = array<i32>} : memref<4x288xf32, #tpu.memory_space<vmem>>, vector<4x288xf32>,
    %210 = vector.broadcast %202 : vector<1x288xf32> to vector<4x288xf32>
    %211 = arith.mulf %210, %201 : vector<4x288xf32>
    %212 = vector.broadcast %203 : vector<1x288xf32> to vector<4x288xf32>
    %213 = arith.mulf %212, %200 : vector<4x288xf32>
    %214 = arith.addf %211, %213 : vector<4x288xf32>
    %c0_184 = arith.constant 0 : index
    %c0_185 = arith.constant 0 : index
    %215 = vector.load %arg12[%c0_184, %c0_185] : memref<4x288xf32, #tpu.memory_space<vmem>>, vector<4x288xf32>
    tpu.vector_store %arg12[%c0_184, %c0_185], %214 {strides = array<i32>} : memref<4x288xf32, #tpu.memory_space<vmem>>, vector<4x288xf32>,
    return
  }
}

module attributes {stable_mosaic.version = 11 : i64} {
  func.func @_dc_kernel(%arg0: i32, %arg1: memref<1xf32, #tpu.memory_space<smem>>, %arg2: memref<1x16x16xf32, #tpu.memory_space<vmem>>, %arg3: memref<1x16x16xf32, #tpu.memory_space<vmem>>, %arg4: memref<1x16x16xf32, #tpu.memory_space<vmem>>, %arg5: memref<1x16x16xf32, #tpu.memory_space<vmem>>, %arg6: memref<16x16xf32, #tpu.memory_space<vmem>>, %arg7: memref<1x16x16xf32, #tpu.memory_space<vmem>>, %arg8: memref<1x16x16xf32, #tpu.memory_space<vmem>>) attributes {dimension_semantics = [#tpu.dimension_semantics<parallel>], iteration_bounds = array<i64: 4>, scalar_prefetch = 0 : i64, scratch_operands = 0 : i64, tpu.core_type = #tpu.core_type<tc>, window_params = [{transform_indices = @transform_0, window_bounds = array<i64: 1>}, {transform_indices = @transform_1, window_bounds = array<i64: 1, 16, 16>}, {transform_indices = @transform_2, window_bounds = array<i64: 1, 16, 16>}, {transform_indices = @transform_3, window_bounds = array<i64: 1, 16, 16>}, {transform_indices = @transform_4, window_bounds = array<i64: 1, 16, 16>}, {pipeline_mode = #tpu.pipeline_mode<synchronous>, transform_indices = @transform_5, window_bounds = array<i64: 16, 16>}, {transform_indices = @transform_6, window_bounds = array<i64: 1, 16, 16>}, {transform_indices = @transform_7, window_bounds = array<i64: 1, 16, 16>}]} {
    %c0 = arith.constant 0 : index
    %0 = memref.load %arg1[%c0] : memref<1xf32, #tpu.memory_space<smem>>
    %c0_0 = arith.constant 0 : index
    %c0_1 = arith.constant 0 : index
    %1 = vector.load %arg6[%c0_0, %c0_1] : memref<16x16xf32, #tpu.memory_space<vmem>>, vector<16x16xf32>
    %cst = arith.constant 0.000000e+00 : f32
    %2 = vector.broadcast %cst : f32 to vector<16x16xf32>
    %3 = arith.cmpf one, %1, %2 : vector<16x16xf32>
    %4 = vector.shape_cast %3 : vector<16x16xi1> to vector<1x16x16xi1>
    %c0_2 = arith.constant 0 : index
    %c0_3 = arith.constant 0 : index
    %c0_4 = arith.constant 0 : index
    %5 = vector.load %arg2[%c0_2, %c0_3, %c0_4] : memref<1x16x16xf32, #tpu.memory_space<vmem>>, vector<1x16x16xf32>
    %c0_5 = arith.constant 0 : index
    %c0_6 = arith.constant 0 : index
    %c0_7 = arith.constant 0 : index
    %6 = vector.load %arg4[%c0_5, %c0_6, %c0_7] : memref<1x16x16xf32, #tpu.memory_space<vmem>>, vector<1x16x16xf32>
    %7 = arith.subf %5, %6 : vector<1x16x16xf32>
    %cst_8 = arith.constant 0.000000e+00 : f32
    %8 = vector.broadcast %cst_8 : f32 to vector<1x16x16xf32>
    %9 = arith.select %4, %7, %8 : vector<1x16x16xi1>, vector<1x16x16xf32>
    %10 = vector.broadcast %0 : f32 to vector<1x16x16xf32>
    %11 = arith.mulf %9, %10 : vector<1x16x16xf32>
    %c0_9 = arith.constant 0 : index
    %c0_10 = arith.constant 0 : index
    %c0_11 = arith.constant 0 : index
    %12 = vector.load %arg7[%c0_9, %c0_10, %c0_11] : memref<1x16x16xf32, #tpu.memory_space<vmem>>, vector<1x16x16xf32>
    tpu.vector_store %arg7[%c0_9, %c0_10, %c0_11], %11 {strides = array<i32>} : memref<1x16x16xf32, #tpu.memory_space<vmem>>, vector<1x16x16xf32>,
    %c0_12 = arith.constant 0 : index
    %c0_13 = arith.constant 0 : index
    %c0_14 = arith.constant 0 : index
    %13 = vector.load %arg3[%c0_12, %c0_13, %c0_14] : memref<1x16x16xf32, #tpu.memory_space<vmem>>, vector<1x16x16xf32>
    %c0_15 = arith.constant 0 : index
    %c0_16 = arith.constant 0 : index
    %c0_17 = arith.constant 0 : index
    %14 = vector.load %arg5[%c0_15, %c0_16, %c0_17] : memref<1x16x16xf32, #tpu.memory_space<vmem>>, vector<1x16x16xf32>
    %15 = arith.subf %13, %14 : vector<1x16x16xf32>
    %cst_18 = arith.constant 0.000000e+00 : f32
    %16 = vector.broadcast %cst_18 : f32 to vector<1x16x16xf32>
    %17 = arith.select %4, %15, %16 : vector<1x16x16xi1>, vector<1x16x16xf32>
    %18 = vector.broadcast %0 : f32 to vector<1x16x16xf32>
    %19 = arith.mulf %17, %18 : vector<1x16x16xf32>
    %c0_19 = arith.constant 0 : index
    %c0_20 = arith.constant 0 : index
    %c0_21 = arith.constant 0 : index
    %20 = vector.load %arg8[%c0_19, %c0_20, %c0_21] : memref<1x16x16xf32, #tpu.memory_space<vmem>>, vector<1x16x16xf32>
    tpu.vector_store %arg8[%c0_19, %c0_20, %c0_21], %19 {strides = array<i32>} : memref<1x16x16xf32, #tpu.memory_space<vmem>>, vector<1x16x16xf32>,
    return
  }
  func.func @transform_0(%arg0: i32) -> i32 {
    %c0_i32 = arith.constant 0 : i32
    %c0_i32_0 = arith.constant 0 : i32
    return %c0_i32 : i32
  }
  func.func @transform_1(%arg0: i32) -> (i32, i32, i32) {
    %c0_i32 = arith.constant 0 : i32
    %c0_i32_0 = arith.constant 0 : i32
    %c0_i32_1 = arith.constant 0 : i32
    return %arg0, %c0_i32, %c0_i32_0 : i32, i32, i32
  }
  func.func @transform_2(%arg0: i32) -> (i32, i32, i32) {
    %c0_i32 = arith.constant 0 : i32
    %c0_i32_0 = arith.constant 0 : i32
    %c0_i32_1 = arith.constant 0 : i32
    return %arg0, %c0_i32, %c0_i32_0 : i32, i32, i32
  }
  func.func @transform_3(%arg0: i32) -> (i32, i32, i32) {
    %c0_i32 = arith.constant 0 : i32
    %c0_i32_0 = arith.constant 0 : i32
    %c0_i32_1 = arith.constant 0 : i32
    return %arg0, %c0_i32, %c0_i32_0 : i32, i32, i32
  }
  func.func @transform_4(%arg0: i32) -> (i32, i32, i32) {
    %c0_i32 = arith.constant 0 : i32
    %c0_i32_0 = arith.constant 0 : i32
    %c0_i32_1 = arith.constant 0 : i32
    return %arg0, %c0_i32, %c0_i32_0 : i32, i32, i32
  }
  func.func @transform_5(%arg0: i32) -> (i32, i32) {
    %c0_i32 = arith.constant 0 : i32
    %c0_i32_0 = arith.constant 0 : i32
    %c0_i32_1 = arith.constant 0 : i32
    return %c0_i32, %c0_i32_0 : i32, i32
  }
  func.func @transform_6(%arg0: i32) -> (i32, i32, i32) {
    %c0_i32 = arith.constant 0 : i32
    %c0_i32_0 = arith.constant 0 : i32
    %c0_i32_1 = arith.constant 0 : i32
    return %arg0, %c0_i32, %c0_i32_0 : i32, i32, i32
  }
  func.func @transform_7(%arg0: i32) -> (i32, i32, i32) {
    %c0_i32 = arith.constant 0 : i32
    %c0_i32_0 = arith.constant 0 : i32
    %c0_i32_1 = arith.constant 0 : i32
    return %arg0, %c0_i32, %c0_i32_0 : i32, i32, i32
  }
}

module attributes {stable_mosaic.version = 11 : i64} {
  func.func @_wavg_kernel(%arg0: memref<1xf32, #tpu.memory_space<smem>>, %arg1: memref<4x256xf32, #tpu.memory_space<vmem>>, %arg2: memref<4x256xf32, #tpu.memory_space<vmem>>, %arg3: memref<4x256xf32, #tpu.memory_space<vmem>>, %arg4: memref<4x256xf32, #tpu.memory_space<vmem>>, %arg5: memref<4x256xf32, #tpu.memory_space<vmem>>, %arg6: memref<4x256xf32, #tpu.memory_space<vmem>>, %arg7: memref<4x256xf32, #tpu.memory_space<vmem>>, %arg8: memref<4x256xf32, #tpu.memory_space<vmem>>, %arg9: memref<4x256xf32, #tpu.memory_space<vmem>>, %arg10: memref<4x256xf32, #tpu.memory_space<vmem>>) attributes {dimension_semantics = [], scalar_prefetch = 0 : i64, scratch_operands = 0 : i64, tpu.core_type = #tpu.core_type<tc>} {
    %c0 = arith.constant 0 : index
    %c0_0 = arith.constant 0 : index
    %0 = vector.load %arg7[%c0, %c0_0] : memref<4x256xf32, #tpu.memory_space<vmem>>, vector<4x256xf32>
    %c0_1 = arith.constant 0 : index
    %c0_2 = arith.constant 0 : index
    %1 = vector.load %arg8[%c0_1, %c0_2] : memref<4x256xf32, #tpu.memory_space<vmem>>, vector<4x256xf32>
    %c0_3 = arith.constant 0 : index
    %c0_4 = arith.constant 0 : index
    %2 = vector.load %arg5[%c0_3, %c0_4] : memref<4x256xf32, #tpu.memory_space<vmem>>, vector<4x256xf32>
    %c0_5 = arith.constant 0 : index
    %c0_6 = arith.constant 0 : index
    %3 = vector.load %arg6[%c0_5, %c0_6] : memref<4x256xf32, #tpu.memory_space<vmem>>, vector<4x256xf32>
    %4 = arith.mulf %2, %0 : vector<4x256xf32>
    %5 = arith.mulf %3, %1 : vector<4x256xf32>
    %6 = arith.addf %4, %5 : vector<4x256xf32>
    %cst = arith.constant dense<0.000000e+00> : vector<256xf32>
    %7 = vector.multi_reduction <add>, %6, %cst [0] : vector<4x256xf32> to vector<256xf32>
    %8 = vector.shape_cast %7 : vector<256xf32> to vector<1x256xf32>
    %9 = arith.mulf %3, %0 : vector<4x256xf32>
    %10 = arith.mulf %2, %1 : vector<4x256xf32>
    %11 = arith.subf %9, %10 : vector<4x256xf32>
    %cst_7 = arith.constant dense<0.000000e+00> : vector<256xf32>
    %12 = vector.multi_reduction <add>, %11, %cst_7 [0] : vector<4x256xf32> to vector<256xf32>
    %13 = vector.shape_cast %12 : vector<256xf32> to vector<1x256xf32>
    %c0_8 = arith.constant 0 : index
    %14 = memref.load %arg0[%c0_8] : memref<1xf32, #tpu.memory_space<smem>>
    %c0_9 = arith.constant 0 : index
    %c0_10 = arith.constant 0 : index
    %15 = vector.load %arg1[%c0_9, %c0_10] : memref<4x256xf32, #tpu.memory_space<vmem>>, vector<4x256xf32>
    %c0_11 = arith.constant 0 : index
    %c0_12 = arith.constant 0 : index
    %16 = vector.load %arg3[%c0_11, %c0_12] : memref<4x256xf32, #tpu.memory_space<vmem>>, vector<4x256xf32>
    %17 = arith.addf %15, %16 : vector<4x256xf32>
    %18 = vector.broadcast %14 : f32 to vector<4x256xf32>
    %19 = arith.mulf %18, %17 : vector<4x256xf32>
    %cst_13 = arith.constant 1.000000e+00 : f32
    %20 = arith.subf %cst_13, %14 : f32
    %21 = vector.broadcast %20 : f32 to vector<1x256xf32>
    %22 = arith.mulf %21, %8 : vector<1x256xf32>
    %23 = vector.broadcast %22 : vector<1x256xf32> to vector<4x256xf32>
    %24 = arith.addf %19, %23 : vector<4x256xf32>
    %c0_14 = arith.constant 0 : index
    %c0_15 = arith.constant 0 : index
    %25 = vector.load %arg9[%c0_14, %c0_15] : memref<4x256xf32, #tpu.memory_space<vmem>>, vector<4x256xf32>
    tpu.vector_store %arg9[%c0_14, %c0_15], %24 {strides = array<i32>} : memref<4x256xf32, #tpu.memory_space<vmem>>, vector<4x256xf32>,
    %c0_16 = arith.constant 0 : index
    %c0_17 = arith.constant 0 : index
    %26 = vector.load %arg2[%c0_16, %c0_17] : memref<4x256xf32, #tpu.memory_space<vmem>>, vector<4x256xf32>
    %c0_18 = arith.constant 0 : index
    %c0_19 = arith.constant 0 : index
    %27 = vector.load %arg4[%c0_18, %c0_19] : memref<4x256xf32, #tpu.memory_space<vmem>>, vector<4x256xf32>
    %28 = arith.addf %26, %27 : vector<4x256xf32>
    %29 = vector.broadcast %14 : f32 to vector<4x256xf32>
    %30 = arith.mulf %29, %28 : vector<4x256xf32>
    %cst_20 = arith.constant 1.000000e+00 : f32
    %31 = arith.subf %cst_20, %14 : f32
    %32 = vector.broadcast %31 : f32 to vector<1x256xf32>
    %33 = arith.mulf %32, %13 : vector<1x256xf32>
    %34 = vector.broadcast %33 : vector<1x256xf32> to vector<4x256xf32>
    %35 = arith.addf %30, %34 : vector<4x256xf32>
    %c0_21 = arith.constant 0 : index
    %c0_22 = arith.constant 0 : index
    %36 = vector.load %arg10[%c0_21, %c0_22] : memref<4x256xf32, #tpu.memory_space<vmem>>, vector<4x256xf32>
    tpu.vector_store %arg10[%c0_21, %c0_22], %35 {strides = array<i32>} : memref<4x256xf32, #tpu.memory_space<vmem>>, vector<4x256xf32>,
    return
  }
}

</mosaic_0001>

<bundles_post_ra>
// kernel: squeeze.16
= control target key start
LH: loop header
LB: loop body
LE: loop exit
PB: predicated region body
PF: predicated region fallthrough
CT: control target
= control target key end

     0   :  { %s15_s6 = smov 3  ;;  %s18_s7 = smov 12  ;;  %vm20_vm0 = vcmask 1043458   ;;  %vm25_vm1 = vcmask 1045508   ;;  %vm30_vm2 = vcmask 1047558   ;;  %vm4_vm3 = vcmask 1047556   ;;  %s367_s0 = inlined_call_operand.vmem [shape: f32[1,4,16,16,1], index: 0, kind: input, shape index: {}]   ;;  %s368_s1 = inlined_call_operand.vmem [shape: f32[4,256], index: 1, kind: output, shape index: {}]  }
   0x1   :  { %v196_v0 = vld [vmem:[%s367_s0 + $0x7] ss:$16 sm:%s15_s6]   ;;  %s23_s12 = smov 48  ;;  %s28_s13 = smov 192  ;;  %vm6_vm4 = vcmask 130048   ;;  %vm34_vm5 = vcmask 1048448  }
   0x2   :  { %v197_v1 = vld [vmem:[%s367_s0 + $0x7] ss:$16 sm:%s18_s7]   ;;  %v198_v3 = vld [vmem:[%s367_s0 - $0x31] ss:$16 sm:%s23_s12]   ;;  %s63_s18 = smov 3  ;;  %s66_s21 = smov 12 }
   0x3   :  { %v21_v2 = vsel %vm20_vm0, %v197_v1, %v196_v0  ;;  %v199_v4 = vld [vmem:[%s367_s0 - $0x31] ss:$16 sm:%s28_s13]   ;;  %v204_v6 = vld [vmem:[%s367_s0 + $0x5] ss:$16 sm:%s63_s18]   ;;  %s71_s22 = smov 48  ;;  %s76_s27 = smov 192 }
   0x4   :  { %v26_v5 = vsel %vm25_vm1, %v198_v3, %v21_v2  ;;  %v205_v8 = vld [vmem:[%s367_s0 + $0x5] ss:$16 sm:%s66_s21]   ;;  %v206_v9 = vld [vmem:[%s367_s0 - $0x33] ss:$16 sm:%s71_s22]   ;;  %s232_s28 = smov 112   ;;  %s39_s2 = smov 3 }
   0x5   :  { %v31_v7 = vsel %vm30_vm2, %v199_v4, %v26_v5  ;;  %v69_v10 = vsel %vm20_vm0, %v205_v8, %v204_v6  ;;  %v207_v11 = vld [vmem:[%s367_s0 - $0x33] ss:$16 sm:%s76_s27]   ;;  %s42_s3 = smov 12  ;;  %v200_v13 = vld [vmem:[%s367_s0 + $0x6] ss:$16 sm:%s39_s2]   ;;  %s47_s8 = smov 48 }
   0x6   :  { %32 = vrot.lane.b32.xlu0 %v31_v7, %s232_s28  ;;  %v74_v12 = vsel %vm25_vm1, %v206_v9, %v69_v10  ;;  %v201_v14 = vld [vmem:[%s367_s0 + $0x6] ss:$16 sm:%s42_s3]   ;;  %s52_s9 = smov 192  ;;  %s87_s14 = smov 3  ;;  %vm58_vm6 = vcmask 917248   ;;  %vm82_vm7 = vcmask 786048  }
   0x7   :  { %v79_v15 = vsel %vm30_vm2, %v207_v11, %v74_v12  ;;  %v45_v16 = vsel %vm20_vm0, %v201_v14, %v200_v13  ;;  %v202_v17 = vld [vmem:[%s367_s0 - $0x32] ss:$16 sm:%s47_s8]   ;;  %s233_s15 = smov 80   ;;  %v208_v20 = vld [vmem:[%s367_s0 + $0x4] ss:$16 sm:%s87_s14]   ;;  %s90_s18 = smov 12 }
   0x8   :  { %v203_v18 = vld [vmem:[%s367_s0 - $0x32] ss:$16 sm:%s52_s9]   ;;  %80 = vrot.lane.b32.xlu1 %v79_v15, %s233_s15  ;;  %v50_v19 = vsel %vm25_vm1, %v202_v17, %v45_v16  ;;  %s95_s19 = smov 48  ;;  %s100_s24 = smov 192  ;;  %vm106_vm8 = vcmask 654848   ;;  %vm130_vm9 = vcmask 523648  }
   0x9   :  { %v55_v21 = vsel %vm30_vm2, %v203_v18, %v50_v19  ;;  %v209_v22 = vld [vmem:[%s367_s0 + $0x4] ss:$16 sm:%s90_s18]   ;;  %v210_v23 = vld [vmem:[%s367_s0 - $0x34] ss:$16 sm:%s95_s19]   ;;  %s234_s25 = smov 96   ;;  %s111_s28 = smov 3 }
   0xa   :  { %56 = vrot.lane.b32.xlu0 %v55_v21, %s234_s25  ;;  %v93_v24 = vsel %vm20_vm0, %v209_v22, %v208_v20  ;;  %v211_v25 = vld [vmem:[%s367_s0 - $0x34] ss:$16 sm:%s100_s24]   ;;  %s114_s29 = smov 12  ;;  %s119_s5 = smov 48  ;;  %vm154_vm10 = vcmask 392448   ;;  %vm178_vm11 = vcmask 261248  }
   0xb   :  { %v98_v26 = vsel %vm25_vm1, %v210_v23, %v93_v24  ;;  %v212_v27 = vld [vmem:[%s367_s0 + $0x3] ss:$16 sm:%s111_s28]   ;;  %s124_s6 = smov 192  ;;  %v214_v31 = vld [vmem:[%s367_s0 - $0x35] ss:$16 sm:%s119_s5]   ;;  %s135_s11 = smov 3 }
   0xc   :  { %v213_v28 = vld [vmem:[%s367_s0 + $0x3] ss:$16 sm:%s114_s29]   ;;  %v103_v29 = vsel %vm30_vm2, %v211_v25, %v98_v26  ;;  %v215_v32 = vld [vmem:[%s367_s0 - $0x35] ss:$16 sm:%s124_s6]   ;;  %s235_s12 = smov 64   ;;  %s138_s15 = smov 12 }
   0xd   :  { %v117_v30 = vsel %vm20_vm0, %v213_v28, %v212_v27  ;;  %104 = vrot.lane.b32.xlu1 %v103_v29, %s235_s12  ;;  %v216_v34 = vld [vmem:[%s367_s0 + $0x2] ss:$16 sm:%s135_s11]   ;;  %s143_s16 = smov 48  ;;  %s148_s21 = smov 192 }
   0xe   :  { %v122_v33 = vsel %vm25_vm1, %v214_v31, %v117_v30  ;;  %v217_v36 = vld [vmem:[%s367_s0 + $0x2] ss:$16 sm:%s138_s15]   ;;  %v218_v37 = vld [vmem:[%s367_s0 - $0x36] ss:$16 sm:%s143_s16]   ;;  %s236_s22 = smov 48   ;;  %s159_s25 = smov 3 }
   0xf   :  { %v127_v35 = vsel %vm30_vm2, %v215_v32, %v122_v33  ;;  %v141_v38 = vsel %vm20_vm0, %v217_v36, %v216_v34  ;;  %v219_v39 = vld [vmem:[%s367_s0 - $0x36] ss:$16 sm:%s148_s21]   ;;  %s162_s26 = smov 12  ;;  %v220_v41 = vld [vmem:[%s367_s0 + $0x1] ss:$16 sm:%s159_s25]   ;;  %s167_s2 = smov 48 }
  0x10   :  { %128 = vrot.lane.b32.xlu0 %v127_v35, %s236_s22  ;;  %v146_v40 = vsel %vm25_vm1, %v218_v37, %v141_v38  ;;  %v221_v42 = vld [vmem:[%s367_s0 + $0x1] ss:$16 sm:%s162_s26]   ;;  %s172_s3 = smov 192  ;;  %s237_s8 = smov 32  }
  0x11   :  { %v151_v43 = vsel %vm30_vm2, %v219_v39, %v146_v40  ;;  %v165_v44 = vsel %vm20_vm0, %v221_v42, %v220_v41  ;;  %v222_v45 = vld [vmem:[%s367_s0 - $0x37] ss:$16 sm:%s167_s2]   ;;  %v2_v48 = vld [vmem:[%s367_s0] ss:$8 sm:$0xf]  }
  0x12   :  { %v223_v46 = vld [vmem:[%s367_s0 - $0x37] ss:$16 sm:%s172_s3]   ;;  %152 = vrot.lane.b32.xlu1 %v151_v43, %s237_s8  ;;  %v170_v47 = vsel %vm25_vm1, %v222_v45, %v165_v44  ;;  %v3_v49 = vld [vmem:[%s367_s0] ss:$8 sm:$0xf0]   ;;  %s238_s0 = smov 16  }
  0x13   :  { %v175_v50 = vsel %vm30_vm2, %v223_v46, %v170_v47  ;;  %v5_v51 = vsel %vm4_vm3, %v3_v49, %v2_v48 }
  0x14   :  { %176 = vrot.lane.b32.xlu0 %v175_v50, %s238_s0  ;;  %7 = vst.msk [vmem:[#allocation0] ss:$8 sm:$0x3] %vm6_vm4, %v5_v51   ;;  %9 = vst.msk [vmem:[#allocation0 - $0xf] ss:$8 sm:$0xc] %vm6_vm4, %v5_v51  }
  0x15   :  { %11 = vst.msk [vmem:[#allocation0 - $0x1e] ss:$8 sm:$0x30] %vm6_vm4, %v5_v51   ;;  %13 = vst.msk [vmem:[#allocation0 - $0x2d] ss:$8 sm:$0xc0] %vm6_vm4, %v5_v51  }
  0x78   :  { %v33_v52 = vpop.permute.xlu0 %32  }
  0x79   :  { %35 = vst.msk [vmem:[#allocation0] sm:$0xf] %vm34_vm5, %v33_v52   ;;  %37 = vst.msk [vmem:[#allocation0 + $0x4] sm:$0xf0] %vm34_vm5, %v33_v52  }
  0x7a   :  { %v81_v53 = vpop.permute.xlu1 %80  }
  0x7c   :  { %v57_v54 = vpop.permute.xlu0 %56  }
  0x7d   :  { %59 = vst.msk [vmem:[#allocation0] sm:$0xf] %vm58_vm6, %v57_v54   ;;  %61 = vst.msk [vmem:[#allocation0 + $0x4] sm:$0xf0] %vm58_vm6, %v57_v54  }
  0x7e   :  { %83 = vst.msk [vmem:[#allocation0] sm:$0xf] %vm82_vm7, %v81_v53   ;;  %85 = vst.msk [vmem:[#allocation0 + $0x4] sm:$0xf0] %vm82_vm7, %v81_v53  }
  0x7f   :  { %v105_v55 = vpop.permute.xlu1 %104  }
  0x80   :  { %107 = vst.msk [vmem:[#allocation0] sm:$0xf] %vm106_vm8, %v105_v55   ;;  %109 = vst.msk [vmem:[#allocation0 + $0x4] sm:$0xf0] %vm106_vm8, %v105_v55  }
  0x82   :  { %v129_v56 = vpop.permute.xlu0 %128  }
  0x83   :  { %131 = vst.msk [vmem:[#allocation0] sm:$0xf] %vm130_vm9, %v129_v56   ;;  %133 = vst.msk [vmem:[#allocation0 + $0x4] sm:$0xf0] %vm130_vm9, %v129_v56  }
  0x84   :  { %v153_v57 = vpop.permute.xlu1 %152  }
  0x85   :  { %155 = vst.msk [vmem:[#allocation0] sm:$0xf] %vm154_vm10, %v153_v57   ;;  %157 = vst.msk [vmem:[#allocation0 + $0x4] sm:$0xf0] %vm154_vm10, %v153_v57  }
  0x86   :  { %v177_v58 = vpop.permute.xlu0 %176  }
  0x87   :  { %179 = vst.msk [vmem:[#allocation0] sm:$0xf] %vm178_vm11, %v177_v58   ;;  %181 = vst.msk [vmem:[#allocation0 + $0x4] sm:$0xf0] %vm178_vm11, %v177_v58  }
  0x8e   :  { %v186_v59 = vld [vmem:[#allocation0] sm:$0xf]  ;;  %v191_v60 = vld [vmem:[#allocation0 + $0x8] sm:$0xf] }
  0x8f   :  { %189 = vst [vmem:[%s368_s1] sm:$0xf] %v186_v59  ;;  %224 = vst [vmem:[%s368_s1 + $0x4] sm:$0xf] %v191_v60 }

// kernel: vsnet_block_forward.7
= control target key start
LH: loop header
LB: loop body
LE: loop exit
PB: predicated region body
PF: predicated region fallthrough
CT: control target
= control target key end

     0   :  { %s592_s26 = smov 0   ;;  %s631_s0 = inlined_call_operand.<no memory space> [shape: f32[1], index: 0, kind: input, shape index: {}]   ;;  %s632_s1 = inlined_call_operand.vmem [shape: f32[4,16,16], index: 1, kind: input, shape index: {}]   ;;  %s633_s2 = inlined_call_operand.vmem [shape: f32[4,16,16], index: 2, kind: input, shape index: {}]   ;;  %s634_s3 = inlined_call_operand.vmem [shape: f32[4,16,16], index: 3, kind: input, shape index: {}]   ;;  %s635_s4 = inlined_call_operand.vmem [shape: f32[4,16,16], index: 4, kind: input, shape index: {}]   ;;  %s636_s5 = inlined_call_operand.vmem [shape: f32[16,16], index: 5, kind: input, shape index: {}]   ;;  %s637_s6 = inlined_call_operand.vmem [shape: f32[4,16,16], index: 6, kind: output, shape index: {0}]   ;;  %s638_s7 = inlined_call_operand.vmem [shape: f32[4,16,16], index: 7, kind: output, shape index: {1}]  }
   0x1   :  { %13 = sst [smem:[#allocation2]] %s631_s0 }
   0x2 LB: > { %s508_s27 = sadd.s32 4294967295, %s547_s26   ;;  %p512_p0 = scmp.ge.s32.totalorder %s547_s26, 1  ;;  %s547_s26 = sphi %s592_s26, %s19_s26  }
   0x3   : > { %p271_p1 = scmp.lt.s32.totalorder %s547_s26, 5 }
   0x5   : > { %p272_p2 = pnand %p512_p0, %p271_p1 }
   0x6   : > { %p323_p3 = scmp.lt.s32.totalorder (!%p272_p2), %s508_s27, 3  ;;  %s353_s28 = sld [smem:[#allocation2]] (!%p272_p2) }
   0x7   : > { %275 = sbr.rel (%p272_p2) target bundleno = 25 (0x19), region = 44 }
   0xc   : > { %s640_s27 = smov (!%p323_p3, %s508_s27), 3  ;;  %v354_v0 = vld [vmem:[%s636_s5] sm:$0xff]  ;;  %v355_v1 = vld [vmem:[%s636_s5 + $0x8] sm:$0xff]  ;;  %v366_v6 = vstv %s353_s28  ;;  %vm369_vm2 = vcmask 130048  }
   0xd   : > { %s527_s30 = sshll.u32 %s640_s27, 4  ;;  %vm356_vm0 = vcmp.ne.f32.partialorder %v354_v0, 0.0  ;;  %vm357_vm1 = vcmp.ne.f32.partialorder %v355_v1, 0.0 }
   0xe   : > { %s327_s12 = scalar_lea.vmem %s632_s1, %s527_s30  ;;  %s337_s15 = scalar_lea.vmem %s634_s3, %s527_s30 }
   0xf   : > { %v358_v2 = vld [vmem:[%s327_s12] sm:$0xff]  ;;  %v359_v4 = vld [vmem:[%s327_s12 + $0x8] sm:$0xff]  ;;  %s332_s18 = scalar_lea.vmem %s633_s2, %s527_s30  ;;  %s342_s21 = scalar_lea.vmem %s635_s4, %s527_s30 }
  0x10   : > { %v360_v3 = vld [vmem:[%s337_s15] sm:$0xff]  ;;  %v361_v7 = vld [vmem:[%s337_s15 + $0x8] sm:$0xff]  ;;  %s347_s24 = scalar_lea.vmem %s637_s6, %s527_s30  ;;  %s352_s28 = scalar_lea.vmem %s638_s7, %s527_s30 }
  0x11   : > { %v362_v5 = vsub.f32 %v358_v2, %v360_v3  ;;  %v372_v8 = vld [vmem:[%s332_s18] sm:$0xff]  ;;  %v373_v9 = vld [vmem:[%s332_s18 + $0x8] sm:$0xff]  ;;  %v363_v10 = vsub.f32 %v359_v4, %v361_v7 }
  0x12   : > { %v374_v11 = vld [vmem:[%s342_s21] sm:$0xff]  ;;  %v375_v12 = vld [vmem:[%s342_s21 + $0x8] sm:$0xff] }
  0x13   : > { %v364_v13 = vsel %vm356_vm0, %v362_v5, 0.0  ;;  %v376_v14 = vsub.f32 %v372_v8, %v374_v11  ;;  %v377_v15 = vsub.f32 %v373_v9, %v375_v12  ;;  %v365_v17 = vsel %vm357_vm1, %v363_v10, 0.0 }
  0x14   : > { %v367_v16 = vmul.f32 %v366_v6, %v364_v13  ;;  %v368_v18 = vmul.f32 %v366_v6, %v365_v17 }
  0x15   : > { %v378_v19 = vsel %vm356_vm0, %v376_v14, 0.0  ;;  %v379_v20 = vsel %vm357_vm1, %v377_v15, 0.0 }
  0x16   : > { %370 = vst.msk [vmem:[%s347_s24] sm:$0xff] %vm369_vm2, %v367_v16  ;;  %v380_v21 = vmul.f32 %v378_v19, %v366_v6  ;;  %v381_v22 = vmul.f32 %v379_v20, %v366_v6  ;;  %371 = vst.msk [vmem:[%s347_s24 + $0x8] sm:$0xff] %vm369_vm2, %v368_v18 }
  0x18   : > { %382 = vst.msk [vmem:[%s352_s28] sm:$0xff] %vm369_vm2, %v380_v21  ;;  %383 = vst.msk [vmem:[%s352_s28 + $0x8] sm:$0xff] %vm369_vm2, %v381_v22 }
  0x19 PF: > { %s19_s26 = sadd.s32 1, %s547_s26  }
  0x1a   : > { %p16_p4 = scmp.ge.s32.totalorder %s19_s26, 6  }
  0x1c   :  { %18 = sbr.rel (!%p16_p4) target bundleno = 2 (0x2), region = 95 }

// kernel: vsnet_block_forward.8
= control target key start
LH: loop header
LB: loop body
LE: loop exit
PB: predicated region body
PF: predicated region fallthrough
CT: control target
= control target key end

     0   :  { %vm45_vm0 = vcmask 1043456   ;;  %s207_s5 = inlined_call_operand.vmem [shape: f32[4,256], index: 5, kind: input, shape index: {}]   ;;  %s208_s6 = inlined_call_operand.vmem [shape: f32[4,256], index: 6, kind: input, shape index: {}]   ;;  %s209_s7 = inlined_call_operand.vmem [shape: f32[4,256], index: 7, kind: input, shape index: {}]   ;;  %s210_s8 = inlined_call_operand.vmem [shape: f32[4,256], index: 8, kind: input, shape index: {}]   ;;  %s211_s0 = inlined_call_operand.<no memory space> [shape: f32[1], index: 0, kind: input, shape index: {}]   ;;  %s212_s1 = inlined_call_operand.vmem [shape: f32[4,256], index: 1, kind: input, shape index: {}, may-alias: {1,9}]   ;;  %s213_s3 = inlined_call_operand.vmem [shape: f32[4,256], index: 3, kind: input, shape index: {}]   ;;  %s214_s2 = inlined_call_operand.vmem [shape: f32[4,256], index: 2, kind: input, shape index: {}, may-alias: {2,10}]   ;;  %s215_s4 = inlined_call_operand.vmem [shape: f32[4,256], index: 4, kind: input, shape index: {}]   ;;  %s216_s9 = inlined_call_operand.vmem [shape: f32[4,256], index: 9, kind: output, shape index: {0}, may-alias: {1,9}]   ;;  %s217_s10 = inlined_call_operand.vmem [shape: f32[4,256], index: 10, kind: output, shape index: {1}, may-alias: {2,10}]  }
   0x1   :  { %v35_v0 = vld [vmem:[%s209_s7] sm:$0xff]  ;;  %s86_s21 = ssub.f32 1.0, %s211_s0  ;;  %v84_v45 = vstv %s211_s0 }
   0x2   :  { %v36_v1 = vld [vmem:[%s210_s8] sm:$0xff] }
   0x3   :  { %v37_v2 = vld [vmem:[%s207_s5] sm:$0xff]  ;;  %v87_v39 = vstv %s86_s21 }
   0x4   :  { %v38_v3 = vld [vmem:[%s208_s6] sm:$0xff]  ;;  %v39_v4 = vmul.f32 %v37_v2, %v35_v0  ;;  %v61_v5 = vmul.f32 %v37_v2, %v36_v1 }
   0x5   :  { %v40_v6 = vmul.f32 %v38_v3, %v36_v1  ;;  %v60_v7 = vmul.f32 %v38_v3, %v35_v0  ;;  %v81_v26 = vld [vmem:[%s212_s1] sm:$0xff] }
   0x6   :  { %v82_v29 = vld [vmem:[%s213_s3] sm:$0xff] }
   0x7   :  { %v41_v8 = vadd.f32 %v40_v6, %v39_v4  ;;  %v62_v9 = vsub.f32 %v60_v7, %v61_v5  ;;  %v96_v32 = vld [vmem:[%s214_s2] sm:$0xff]  ;;  %v83_v38 = vadd.f32 %v82_v29, %v81_v26 }
   0x8   :  { %v97_v33 = vld [vmem:[%s215_s4] sm:$0xff] }
   0x9   :  { %v43_v10 = vcombine.high %v41_v8, %v41_v8  ;;  %v46_v11 = vsel %vm45_vm0, %v41_v8, 0.0  ;;  %v64_v12 = vcombine.high %v62_v9, %v62_v9  ;;  %v66_v13 = vsel %vm45_vm0, %v62_v9, 0.0 }
   0xa   :  { %v47_v14 = vrot.slane %v46_v11, 4  ;;  %v67_v15 = vrot.slane %v66_v13, 4  ;;  %v98_v40 = vadd.f32 %v97_v33, %v96_v32  ;;  %v85_v50 = vmul.f32 %v84_v45, %v83_v38 }
   0xb   :  { %v53_v16 = vsel %vm45_vm0, %v43_v10, 0.0  ;;  %v73_v17 = vsel %vm45_vm0, %v64_v12, 0.0 }
   0xc   :  { %v48_v18 = vadd.f32 %v47_v14, %v46_v11  ;;  %v54_v19 = vrot.slane %v53_v16, 4  ;;  %v68_v20 = vadd.f32 %v67_v15, %v66_v13  ;;  %v74_v21 = vrot.slane %v73_v17, 4 }
   0xd   :  { %v99_v52 = vmul.f32 %v98_v40, %v84_v45 }
   0xe   :  { %v49_v22 = vrot.slane %v48_v18, 2  ;;  %v55_v23 = vadd.f32 %v54_v19, %v53_v16  ;;  %v69_v24 = vrot.slane %v68_v20, 2  ;;  %v75_v25 = vadd.f32 %v74_v21, %v73_v17 }
  0x10   :  { %v50_v27 = vadd.f32 %v49_v22, %v48_v18  ;;  %v56_v28 = vrot.slane %v55_v23, 2  ;;  %v70_v30 = vadd.f32 %v69_v24, %v68_v20  ;;  %v76_v31 = vrot.slane %v75_v25, 2 }
  0x12   :  { %v51_v34 = vrot.slane %v50_v27, 1  ;;  %v57_v35 = vadd.f32 %v56_v28, %v55_v23  ;;  %v71_v36 = vrot.slane %v70_v30, 1  ;;  %v77_v37 = vadd.f32 %v76_v31, %v75_v25 }
  0x14   :  { %v52_v41 = vadd.f32 %v51_v34, %v50_v27  ;;  %v58_v42 = vrot.slane %v57_v35, 1  ;;  %v72_v43 = vadd.f32 %v71_v36, %v70_v30  ;;  %v78_v44 = vrot.slane %v77_v37, 1 }
  0x16   :  { %v59_v46 = vadd.f32 %v58_v42, %v57_v35  ;;  %v88_v47 = vmul.f32 %v87_v39, %v52_v41  ;;  %v79_v48 = vadd.f32 %v78_v44, %v77_v37  ;;  %v100_v49 = vmul.f32 %v87_v39, %v72_v43 }
  0x18   :  { %v89_v51 = vmul.f32 %v87_v39, %v59_v46  ;;  %v101_v53 = vmul.f32 %v87_v39, %v79_v48 }
  0x1a   :  { %v92_v54 = vcombine.low %v88_v47, %v89_v51  ;;  %v104_v55 = vcombine.low %v100_v49, %v101_v53 }
  0x1c   :  { %v94_v56 = vadd.f32 %v92_v54, %v85_v50  ;;  %v106_v57 = vadd.f32 %v104_v55, %v99_v52 }
  0x1e   :  { %95 = vst [vmem:[%s216_s9] sm:$0xff] %v94_v56  ;;  %107 = vst [vmem:[%s217_s10] sm:$0xff] %v106_v57 }

// kernel: vsnet_block_forward.6
= control target key start
LH: loop header
LB: loop body
LE: loop exit
PB: predicated region body
PF: predicated region fallthrough
CT: control target
= control target key end

     0   :  { %vm113_vm0 = vcmask 703488   ;;  %v5066_v3 = vmov 0.0   ;;  %vm58_vm1 = vcmask 1043456   ;;  %vm73_vm2 = vcmask 551936   ;;  %s5071_s19 = smov 110   ;;  %s5072_s20 = smov 109   ;;  %s5755_s0 = inlined_call_operand.vmem [shape: f32[4,324], index: 0, kind: input, shape index: {}]   ;;  %s5756_s1 = inlined_call_operand.vmem [shape: f32[4,324], index: 1, kind: input, shape index: {}]   ;;  %s5757_s2 = inlined_call_operand.vmem [shape: f32[4,324], index: 2, kind: input, shape index: {}]   ;;  %s5758_s3 = inlined_call_operand.vmem [shape: f32[4,324], index: 3, kind: input, shape index: {}]   ;;  %s5759_s5 = inlined_call_operand.vmem [shape: f32[8,1], index: 5, kind: input, shape index: {}]   ;;  %s5760_s4 = inlined_call_operand.vmem [shape: f32[9,8,2], index: 4, kind: input, shape index: {}]   ;;  %s5761_s10 = inlined_call_operand.<no memory space> [shape: f32[1], index: 10, kind: input, shape index: {}]   ;;  %s5762_s7 = inlined_call_operand.vmem [shape: f32[8,1], index: 7, kind: input, shape index: {}]   ;;  %s5763_s6 = inlined_call_operand.vmem [shape: f32[9,8,8], index: 6, kind: input, shape index: {}]   ;;  %s5764_s9 = inlined_call_operand.vmem [shape: f32[2,1], index: 9, kind: input, shape index: {}]   ;;  %s5765_s8 = inlined_call_operand.vmem [shape: f32[9,2,8], index: 8, kind: input, shape index: {}]   ;;  %s5766_s11 = inlined_call_operand.vmem [shape: f32[4,288], index: 11, kind: output, shape index: {0}]   ;;  %s5767_s12 = inlined_call_operand.vmem [shape: f32[4,288], index: 12, kind: output, shape index: {1}]  }
   0x1   :  { %v41_v0 = vld [vmem:[%s5757_s2] sm:$0xff]  ;;  %v42_v1 = vld [vmem:[%s5757_s2 + $0x8] sm:$0xf]  ;;  %111 = vst [vmem:[#allocation2] sm:$0xff] %v5066_v3  ;;  %112 = vst [vmem:[#allocation2 + $0x8] sm:$0xff] %v5066_v3  ;;  %4906 = vmatprep.subr.mxu1 %v5066_v3  ;;  %326 = vmatprep.mubr.f32.mxu0 %v5066_v3  ;;  %v122_v23 = vlaneseq  ;;  %vm5068_vm4 = vmmov 0  }
   0x2   :  { %v43_v2 = vld [vmem:[%s5758_s3] sm:$0xff]  ;;  %114 = vst.msk [vmem:[#allocation2 + $0x10] sm:$0xff] %vm113_vm0, %v5066_v3  ;;  %v44_v4 = vld [vmem:[%s5758_s3 + $0x8] sm:$0xf]  ;;  %v5067_v21 = vmov 1966171168   ;;  %4908 = vmatprep.mubr.msk.f32.mxu1 %vm5068_vm4, %v5066_v3 }
   0x3   :  { %v45_v5 = vld [vmem:[%s5755_s0] sm:$0xff]  ;;  %v46_v6 = vld [vmem:[%s5755_s0 + $0x8] sm:$0xf]  ;;  %v120_v22 = vunpack.c.l.s4 %v5067_v21  ;;  %v5178_v49 = vshrl.u32 %v122_v23, 7  ;;  %vm144_vm3 = vcmp.lt.s32.totalorder %v122_v23, 324  ;;  %s5069_s0 = smov 127  }
   0x4   :  { %v47_v7 = vld [vmem:[%s5756_s1] sm:$0xff]  ;;  %v48_v8 = vld [vmem:[%s5756_s1 + $0x8] sm:$0xf]  ;;  %v49_v9 = vmul.f32 %v45_v5, %v41_v0  ;;  %v50_v10 = vmul.f32 %v46_v6, %v42_v1  ;;  %v83_v11 = vmul.f32 %v45_v5, %v43_v2  ;;  %v84_v12 = vmul.f32 %v46_v6, %v44_v4  ;;  %s5070_s1 = smov 126   ;;  %s5073_s21 = smov 108  }
   0x5   :  { %v51_v13 = vmul.f32 %v47_v7, %v43_v2  ;;  %v52_v14 = vmul.f32 %v48_v8, %v44_v4  ;;  %v81_v15 = vmul.f32 %v47_v7, %v41_v0  ;;  %v82_v16 = vmul.f32 %v48_v8, %v42_v1  ;;  %s5074_s22 = smov 92   ;;  %s5076_s23 = smov 91  }
   0x6   :  { %v121_v48 = vunpack.c.0.s8 %v120_v22  ;;  %v5075_v21 = vmov 0   ;;  %s5077_s24 = smov 90   ;;  %v1701_v22 = vld [vmem:[%s5759_s5] sm:$0xff]  ;;  %vm255_vm5 = vcmask 1041408   ;;  %vm248_vm6 = vcmask 1039360  }
   0x7   :  { %v53_v17 = vadd.f32 %v51_v13, %v49_v9  ;;  %v54_v18 = vadd.f32 %v52_v14, %v50_v10  ;;  %v85_v19 = vsub.f32 %v81_v15, %v83_v11  ;;  %v86_v20 = vsub.f32 %v82_v16, %v84_v12  ;;  %5060 = vset.pattern.permute.xlu0 %v5075_v21 }
   0x8   :  { %v124_v62 = vsub.s32 %v121_v48, %v5178_v49  ;;  %5061 = vset.pattern.permute.xlu1 %v5075_v21  ;;  %vm251_vm7 = vcmask 15360   ;;  %vm561_vm8 = vcmask 1031168   ;;  %vm725_vm9 = vcmask 900096   ;;  %v4770_v48 = vld [vmem:[%s5760_s4 + $0x20] sm:$0xff] }
   0x9   :  { %v56_v24 = vcombine.high %v53_v17, %v53_v17  ;;  %v59_v25 = vsel %vm58_vm1, %v53_v17, 0.0  ;;  %v74_v26 = vsel %vm73_vm2, %v54_v18, 0.0  ;;  %v88_v27 = vcombine.high %v85_v19, %v85_v19 }
   0xa   :  { %v60_v28 = vrot.slane %v59_v25, 4  ;;  %v75_v29 = vrot.slane %v74_v26, 4  ;;  %v90_v30 = vsel %vm58_vm1, %v85_v19, 0.0  ;;  %v104_v31 = vsel %vm73_vm2, %v86_v20, 0.0 }
   0xb   :  { %v66_v32 = vsel %vm58_vm1, %v56_v24, 0.0  ;;  %v91_v33 = vrot.slane %v90_v30, 4  ;;  %v97_v34 = vsel %vm58_vm1, %v88_v27, 0.0  ;;  %v105_v35 = vrot.slane %v104_v31, 4 }
   0xc   :  { %v61_v36 = vadd.f32 %v60_v28, %v59_v25  ;;  %v67_v37 = vrot.slane %v66_v32, 4  ;;  %v76_v38 = vadd.f32 %v75_v29, %v74_v26  ;;  %v98_v39 = vrot.slane %v97_v34, 4  ;;  %v4747_v26 = vld [vmem:[%s5760_s4 + $0x8] sm:$0xff] }
   0xd   :  { %v92_v40 = vadd.f32 %v91_v33, %v90_v30  ;;  %v106_v41 = vadd.f32 %v105_v35, %v104_v31  ;;  %v236_v33 = vld [vmem:[%s5760_s4] sm:$0xff]  ;;  %vm889_vm10 = vcmask 891904   ;;  %vm1053_vm11 = vcmask 883712  }
   0xe   :  { %v62_v42 = vrot.slane %v61_v36, 2  ;;  %v68_v43 = vadd.f32 %v67_v37, %v66_v32  ;;  %v77_v44 = vrot.slane %v76_v38, 2  ;;  %v99_v45 = vadd.f32 %v98_v39, %v97_v34  ;;  %v4758_v37 = vld [vmem:[%s5760_s4 + $0x10] sm:$0xff] }
   0xf   :  { %v93_v46 = vrot.slane %v92_v40, 2  ;;  %v107_v47 = vrot.slane %v106_v41, 2  ;;  %vm5770_vm12 = vcmask 752640   ;;  %vm5769_vm13 = vcmask 744448  }
  0x10   :  { %v63_v50 = vadd.f32 %v62_v42, %v61_v36  ;;  %v69_v51 = vrot.slane %v68_v43, 2  ;;  %v78_v52 = vadd.f32 %v77_v44, %v76_v38  ;;  %v100_v53 = vrot.slane %v99_v45, 2  ;;  %v4764_v42 = vld [vmem:[%s5760_s4 + $0x18] sm:$0xff] }
  0x11   :  { %v94_v54 = vadd.f32 %v93_v46, %v92_v40  ;;  %v108_v55 = vadd.f32 %v107_v47, %v106_v41  ;;  %vm5768_vm14 = vcmask 736256  }
  0x12   :  { %v64_v56 = vrot.slane %v63_v50, 1  ;;  %v70_v57 = vadd.f32 %v69_v51, %v68_v43  ;;  %v79_v58 = vrot.slane %v78_v52, 1  ;;  %v101_v59 = vadd.f32 %v100_v53, %v99_v45  ;;  %v4776_v53 = vld [vmem:[%s5760_s4 + $0x28] sm:$0xff] }
  0x13   :  { %v95_v60 = vrot.slane %v94_v54, 1  ;;  %v109_v61 = vrot.slane %v108_v55, 1 }
  0x14   :  { %v65_v63 = vadd.f32 %v64_v56, %v63_v50  ;;  %v71_v0 = vrot.slane %v70_v57, 1  ;;  %v80_v1 = vadd.f32 %v79_v58, %v78_v52  ;;  %v102_v2 = vrot.slane %v101_v59, 1 }
  0x15   :  { %v96_v4 = vadd.f32 %v95_v60, %v94_v54  ;;  %v110_v5 = vadd.f32 %v109_v61, %v108_v55 }
  0x16   :  { %v72_v6 = vadd.f32 %v71_v0, %v70_v57  ;;  %v103_v7 = vadd.f32 %v102_v2, %v101_v59  ;;  %v132_v9 = vrot.slane %v80_v1, %v124_v62  ;;  %v4782_v57 = vld [vmem:[%s5760_s4 + $0x30] sm:$0xff] }
  0x17   :  { %v165_v11 = vrot.slane %v110_v5, %v124_v62 }
  0x18   :  { %v118_v8 = vcombine.low %v65_v63, %v72_v6  ;;  %v151_v10 = vcombine.low %v96_v4, %v103_v7  ;;  %v4794_v6 = vld [vmem:[%s5760_s4 + $0x40] sm:$0xff] }
  0x1a   :  { %v125_v12 = vrot.slane %v118_v8, %v124_v62  ;;  %v158_v13 = vrot.slane %v151_v10, %v124_v62 }
  0x1c   :  { %v133_v14 = vcombine.low %v125_v12, %v132_v9  ;;  %v166_v15 = vcombine.low %v158_v13, %v165_v11 }
  0x1e   :  { %v140_v16 = vrot.slane %v133_v14, %v124_v62  ;;  %v173_v17 = vrot.slane %v166_v15, %v124_v62  ;;  %v4788_v62 = vld [vmem:[%s5760_s4 + $0x38] sm:$0xff] }
  0x20   :  { %146 = vst.msk [vmem:[#allocation2] ss:$8 sm:$0x7] %vm144_vm3, %v140_v16  ;;  %176 = vst.msk [vmem:[#allocation2 + $0x1] ss:$8 sm:$0x7] %vm144_vm3, %v173_v17 }
  0x27   :  { %v5184_v18 = vld [vmem:[#allocation2 + $0x8] sm:$0x3]  ;;  %v5186_v19 = vld [vmem:[#allocation2] sm:$0x3]  ;;  %v235_v20 = vld [vmem:[#allocation2 + $0x10] sm:$0x3] }
  0x28   :  { %244 = vrot.lane.b32.xlu0 %v5184_v18, %s5069_s0  ;;  %242 = vrot.lane.b32.xlu1 %v5186_v19, %s5069_s0 }
  0x2c   :  { %246 = vrot.lane.b32.xlu0 %v235_v20, %s5069_s0  ;;  %557 = vrot.lane.b32.xlu1 %v5184_v18, %s5070_s1 }
  0x30   :  { %559 = vrot.lane.b32.xlu0 %v235_v20, %s5070_s1  ;;  %555 = vrot.lane.b32.xlu1 %v5186_v19, %s5070_s1 }
  0x34   :  { %721 = vrot.lane.b32.xlu0 %v5184_v18, %s5071_s19  ;;  %723 = vrot.lane.b32.xlu1 %v235_v20, %s5071_s19 }
  0x38   :  { %719 = vrot.lane.b32.xlu0 %v5186_v19, %s5071_s19  ;;  %885 = vrot.lane.b32.xlu1 %v5184_v18, %s5072_s20 }
  0x3c   :  { %887 = vrot.lane.b32.xlu0 %v235_v20, %s5072_s20  ;;  %883 = vrot.lane.b32.xlu1 %v5186_v19, %s5072_s20 }
  0x40   :  { %1049 = vrot.lane.b32.xlu0 %v5184_v18, %s5073_s21  ;;  %1051 = vrot.lane.b32.xlu1 %v235_v20, %s5073_s21 }
  0x44   :  { %1047 = vrot.lane.b32.xlu0 %v5186_v19, %s5073_s21  ;;  %1213 = vrot.lane.b32.xlu1 %v5184_v18, %s5074_s22 }
  0x48   :  { %1215 = vrot.lane.b32.xlu0 %v235_v20, %s5074_s22  ;;  %1211 = vrot.lane.b32.xlu1 %v5186_v19, %s5074_s22 }
  0x4c   :  { %1377 = vrot.lane.b32.xlu0 %v5184_v18, %s5076_s23  ;;  %1379 = vrot.lane.b32.xlu1 %v235_v20, %s5076_s23 }
  0x50   :  { %1375 = vrot.lane.b32.xlu0 %v5186_v19, %s5076_s23  ;;  %1541 = vrot.lane.b32.xlu1 %v5184_v18, %s5077_s24 }
  0x54   :  { %1543 = vrot.lane.b32.xlu0 %v235_v20, %s5077_s24  ;;  %1539 = vrot.lane.b32.xlu1 %v5186_v19, %s5077_s24 }
  0x58   :  { %1704 = vperm.xlu0 %5060, %v1701_v22  }
  0x9a   :  { %v245_v24 = vpop.permute.xlu0 %244  ;;  %v243_v25 = vpop.permute.xlu1 %242 }
  0x9b   :  { %v249_v30 = vsel %vm248_vm6, %v243_v25, %v245_v24 }
  0x9e   :  { %v247_v27 = vpop.permute.xlu0 %246  ;;  %v558_v28 = vpop.permute.xlu1 %557 }
  0x9f   :  { %4907 = vmatpush3.msk.msra.mxu1 %vm255_vm5, %v247_v27  ;;  %v250_v29 = vsel %vm248_vm6, %v245_v24, %v247_v27 }
  0xa0   :  { %4748 = vmatprep.subr.msk.mxu0 %vm255_vm5, %v250_v29  ;;  %4909 = vmatmul.mubr.msk.f32.vlgmr.msra.gmra.mxu1 %vm251_vm7, %v4747_v26 }
  0xa1   :  { %4749 = vmatpush1.msk.msra.mxu0 %vm255_vm5, %v249_v30  ;;  %4911 = vmatprep.subr.mxu1 %v5066_v3 }
  0xa2   :  { %4912 = vmatpush3.msk.msra.mxu1 %vm255_vm5, %v235_v20  ;;  %v560_v31 = vpop.permute.xlu0 %559  ;;  %4750 = vmatmul.mubr.msk.f32.vlgmr.msra.gmra.mxu0 %vm251_vm7, %v4747_v26  ;;  %v556_v32 = vpop.permute.xlu1 %555 }
  0xa3   :  { %v563_v34 = vsel %vm561_vm8, %v558_v28, %v560_v31  ;;  %4753 = vmatprep.subr.msk.mxu0 %vm255_vm5, %v5184_v18  ;;  %4913 = vmatprep.mubr.msk.f32.mxu1 %vm5068_vm4, %v5066_v3  ;;  %v562_v38 = vsel %vm561_vm8, %v556_v32, %v558_v28  ;;  %v179_v18 = vand.u32 127, %v122_v23 }
  0xa4   :  { %4754 = vmatpush1.msk.msra.mxu0 %vm255_vm5, %v5186_v19  ;;  %4916 = vmatprep.subr.mxu1 %v5066_v3 }
  0xa5   :  { %4914 = vmatmul.mubr.msk.f32.vlgmr.msra.gmra.mxu1 %vm251_vm7, %v236_v33  ;;  %4759 = vmatprep.subr.msk.mxu0 %vm255_vm5, %v563_v34  ;;  %v181_v24 = vadd.s32 256, %v179_v18 }
  0xa6   :  { %4917 = vmatpush3.msk.msra.mxu1 %vm255_vm5, %v560_v31  ;;  %476 = vmatprep.mubr.f32.mxu0 %v5066_v3  ;;  %v722_v35 = vpop.permute.xlu0 %721  ;;  %v724_v36 = vpop.permute.xlu1 %723  ;;  %v5361_v31 = vmul.u32.u64.low 3817748708, %v179_v18  ;;  %v5362_v32 = vmul.u32.u64.high 3817748708, %v179_v18, %v5361_v31 }
  0xa7   :  { %4755 = vmatmul.mubr.msk.f32.vlgmr.msra.gmra.mxu0 %vm251_vm7, %v236_v33  ;;  %v727_v39 = vsel %vm725_vm9, %v722_v35, %v724_v36  ;;  %4918 = vmatprep.mubr.msk.f32.mxu1 %vm5068_vm4, %v5066_v3  ;;  %v5358_v29 = vmul.u32.u64.low 3817748708, %v181_v24  ;;  %v5359_v30 = vmul.u32.u64.high 3817748708, %v181_v24, %v5358_v29 }
  0xa8   :  { %4760 = vmatpush1.msk.msra.mxu0 %vm255_vm5, %v562_v38  ;;  %4921 = vmatprep.subr.mxu1 %v5066_v3  ;;  %v5384_v29 = vstv %s5761_s10  ;;  %s5078_s10 = smov 19  }
  0xa9   :  { %4919 = vmatmul.mubr.msk.f32.vlgmr.msra.gmra.mxu1 %vm251_vm7, %v4758_v37  ;;  %4765 = vmatprep.subr.msk.mxu0 %vm255_vm5, %v727_v39 }
  0xaa   :  { %4922 = vmatpush3.msk.msra.mxu1 %vm255_vm5, %v724_v36  ;;  %637 = vmatprep.mubr.f32.mxu0 %v5066_v3  ;;  %v720_v40 = vpop.permute.xlu0 %719  ;;  %v886_v41 = vpop.permute.xlu1 %885  ;;  %v180_v36 = vadd.s32 128, %v179_v18 }
  0xab   :  { %v726_v43 = vsel %vm725_vm9, %v720_v40, %v722_v35  ;;  %4761 = vmatmul.mubr.msk.f32.vlgmr.msra.gmra.mxu0 %vm251_vm7, %v4758_v37  ;;  %4923 = vmatprep.mubr.msk.f32.mxu1 %vm5068_vm4, %v5066_v3 }
  0xac   :  { %4766 = vmatpush1.msk.msra.mxu0 %vm255_vm5, %v726_v43  ;;  %801 = vmatprep.mubr.f32.mxu0 %v5066_v3  ;;  %v210_v43 = vshrl.u32 %v5359_v30, 4 }
  0xad   :  { %4926 = vmatprep.subr.mxu1 %v5066_v3  ;;  %4924 = vmatmul.mubr.msk.f32.vlgmr.msra.gmra.mxu1 %vm251_vm7, %v4764_v42 }
  0xae   :  { %v888_v44 = vpop.permute.xlu0 %887  ;;  %v884_v45 = vpop.permute.xlu1 %883  ;;  %4928 = vmatprep.mubr.msk.f32.mxu1 %vm5068_vm4, %v5066_v3 }
  0xaf   :  { %v891_v46 = vsel %vm889_vm10, %v886_v41, %v888_v44  ;;  %4767 = vmatmul.mubr.msk.f32.vlgmr.msra.gmra.mxu0 %vm251_vm7, %v4764_v42  ;;  %v890_v47 = vsel %vm889_vm10, %v884_v45, %v886_v41  ;;  %4927 = vmatpush3.msk.msra.mxu1 %vm255_vm5, %v888_v44  ;;  %v5364_v40 = vmul.u32.u64.low 3817748708, %v180_v36  ;;  %v5365_v41 = vmul.u32.u64.high 3817748708, %v180_v36, %v5364_v40 }
  0xb0   :  { %4771 = vmatprep.subr.msk.mxu0 %vm255_vm5, %v891_v46  ;;  %965 = vmatprep.mubr.f32.mxu0 %v5066_v3  ;;  %v188_v45 = vshrl.u32 %v5362_v32, 4 }
  0xb1   :  { %4772 = vmatpush1.msk.msra.mxu0 %vm255_vm5, %v890_v47  ;;  %4931 = vmatprep.subr.mxu1 %v5066_v3 }
  0xb2   :  { %v1050_v50 = vpop.permute.xlu0 %1049  ;;  %v1052_v51 = vpop.permute.xlu1 %1051  ;;  %4929 = vmatmul.mubr.msk.f32.vlgmr.msra.gmra.mxu1 %vm251_vm7, %v4770_v48 }
  0xb3   :  { %4773 = vmatmul.mubr.msk.f32.vlgmr.msra.gmra.mxu0 %vm251_vm7, %v4770_v48  ;;  %v1055_v52 = vsel %vm1053_vm11, %v1050_v50, %v1052_v51  ;;  %4932 = vmatpush3.msk.msra.mxu1 %vm255_vm5, %v1052_v51  ;;  %v211_v51 = vmul.u32 18, %v210_v43 }
  0xb4   :  { %4777 = vmatprep.subr.msk.mxu0 %vm255_vm5, %v1055_v52  ;;  %4933 = vmatprep.mubr.msk.f32.mxu1 %vm5068_vm4, %v5066_v3 }
  0xb5   :  { %1129 = vmatprep.mubr.f32.mxu0 %v5066_v3  ;;  %4936 = vmatprep.subr.mxu1 %v5066_v3 }
  0xb6   :  { %v1048_v54 = vpop.permute.xlu0 %1047  ;;  %v1214_v55 = vpop.permute.xlu1 %1213  ;;  %4934 = vmatmul.mubr.msk.f32.vlgmr.msra.gmra.mxu1 %vm251_vm7, %v4776_v53 }
  0xb7   :  { %v1054_v56 = vsel %vm1053_vm11, %v1048_v54, %v1050_v50  ;;  %4938 = vmatprep.mubr.msk.f32.mxu1 %vm5068_vm4, %v5066_v3 }
  0xb8   :  { %4778 = vmatpush1.msk.msra.mxu0 %vm255_vm5, %v1054_v56 }
  0xb9   :  { %4779 = vmatmul.mubr.msk.f32.vlgmr.msra.gmra.mxu0 %vm251_vm7, %v4776_v53  ;;  %v189_v53 = vmul.u32 18, %v188_v45 }
  0xba   :  { %v1216_v58 = vpop.permute.xlu0 %1215  ;;  %v1212_v59 = vpop.permute.xlu1 %1211  ;;  %1293 = vmatprep.mubr.f32.mxu0 %v5066_v3 }
  0xbb   :  { %v1219_v60 = vsel %vm5770_vm12, %v1214_v55, %v1216_v58  ;;  %v1218_v61 = vsel %vm5770_vm12, %v1212_v59, %v1214_v55  ;;  %4937 = vmatpush3.msk.msra.mxu1 %vm255_vm5, %v1216_v58  ;;  %v199_v58 = vshrl.u32 %v5365_v41, 4 }
  0xbc   :  { %4783 = vmatprep.subr.msk.mxu0 %vm255_vm5, %v1219_v60  ;;  %4939 = vmatmul.mubr.msk.f32.vlgmr.msra.gmra.mxu1 %vm251_vm7, %v4782_v57  ;;  %v212_v60 = vsub.s32 %v181_v24, %v211_v51 }
  0xbd   :  { %4784 = vmatpush1.msk.msra.mxu0 %vm255_vm5, %v1218_v61  ;;  %4941 = vmatprep.subr.mxu1 %v5066_v3 }
  0xbe   :  { %v1378_v63 = vpop.permute.xlu0 %1377  ;;  %4785 = vmatmul.mubr.msk.f32.vlgmr.msra.gmra.mxu0 %vm251_vm7, %v4782_v57  ;;  %v1380_v0 = vpop.permute.xlu1 %1379  ;;  %4943 = vmatprep.mubr.msk.f32.mxu1 %vm5068_vm4, %v5066_v3  ;;  %vm217_vm15 = vcmp.ne.s32.totalorder %v212_v60, 0  ;;  %vm220_vm0 = vcmp.lt.s32.totalorder %v212_v60, 0 }
  0xbf   :  { %v1383_v1 = vsel %vm5769_vm13, %v1378_v63, %v1380_v0  ;;  %4942 = vmatpush3.msk.msra.mxu1 %vm255_vm5, %v1380_v0  ;;  %1457 = vmatprep.mubr.f32.mxu0 %v5066_v3  ;;  %vm5370_vm3 = vmand %vm220_vm0, %vm217_vm15 }
  0xc0   :  { %4789 = vmatprep.subr.msk.mxu0 %vm255_vm5, %v1383_v1  ;;  %4944 = vmatmul.mubr.msk.f32.vlgmr.msra.gmra.mxu1 %vm251_vm7, %v4788_v62 }
  0xc1   :  { %4946 = vmatprep.subr.mxu1 %v5066_v3  ;;  %4948 = vmatprep.mubr.msk.f32.mxu1 %vm5068_vm4, %v5066_v3 }
  0xc2   :  { %v1376_v2 = vpop.permute.xlu0 %1375  ;;  %v1542_v4 = vpop.permute.xlu1 %1541 }
  0xc3   :  { %v1382_v5 = vsel %vm5769_vm13, %v1376_v2, %v1378_v63 }
  0xc4   :  { %4790 = vmatpush1.msk.msra.mxu0 %vm255_vm5, %v1382_v5 }
  0xc5   :  { %4791 = vmatmul.mubr.msk.f32.vlgmr.msra.gmra.mxu0 %vm251_vm7, %v4788_v62  ;;  %v190_v62 = vsub.s32 %v179_v18, %v189_v53 }
  0xc6   :  { %v1544_v7 = vpop.permute.xlu0 %1543  ;;  %v1540_v8 = vpop.permute.xlu1 %1539  ;;  %1621 = vmatprep.mubr.f32.mxu0 %v5066_v3 }
  0xc7   :  { %v1547_v9 = vsel %vm5768_vm14, %v1542_v4, %v1544_v7  ;;  %v1546_v10 = vsel %vm5768_vm14, %v1540_v8, %v1542_v4  ;;  %4947 = vmatpush3.msk.msra.mxu1 %vm255_vm5, %v1544_v7  ;;  %v200_v4 = vmul.u32 18, %v199_v58  ;;  %v226_v8 = vadd.s32 18, %v212_v60 }
  0xc8   :  { %4795 = vmatprep.subr.msk.mxu0 %vm255_vm5, %v1547_v9  ;;  %4949 = vmatmul.mubr.msk.f32.vlgmr.msra.gmra.mxu1 %vm251_vm7, %v4794_v6  ;;  %vm215_vm1 = vcmp.ne.s32.totalorder %v190_v62, 0  ;;  %vm218_vm2 = vcmp.lt.s32.totalorder %v190_v62, 0 }
  0xc9   :  { %4796 = vmatpush1.msk.msra.mxu0 %vm255_vm5, %v1546_v10  ;;  %4951 = vmatprep.subr.mxu1 %v5066_v3  ;;  %vm5375_vm5 = vmand %vm218_vm2, %vm215_vm1 }
  0xca   :  { %4797 = vmatmul.mubr.msk.f32.vlgmr.msra.gmra.mxu0 %vm251_vm7, %v4794_v6  ;;  %4953 = vmatprep.mubr.msk.f32.mxu1 %vm5068_vm4, %v5066_v3 }
  0xcb   :  { %1838 = vmatprep.mubr.f32.mxu0 %v5066_v3 }
 0x160   :  { %v399_v11 = vpop.f32.mrf.mxu1 }
 0x162   :  { %v328_v12 = vpop.f32.mrf.mxu0  ;;  %v4910_v13 = vpop.f32.mrf.mxu1 }
 0x164   :  { %v330_v14 = vpop.f32.mrf.mxu0 }
 0x165   :  { %v549_v15 = vpop.f32.mrf.mxu1 }
 0x166   :  { %v550_v33 = vadd.f32 %v549_v15, %v399_v11 }
 0x167   :  { %v478_v16 = vpop.f32.mrf.mxu0  ;;  %v4915_v17 = vpop.f32.mrf.mxu1 }
 0x168   :  { %v479_v46 = vadd.f32 %v478_v16, %v328_v12 }
 0x169   :  { %v480_v19 = vpop.f32.mrf.mxu0  ;;  %v710_v20 = vpop.f32.mrf.mxu1 }
 0x16a   :  { %v716_v38 = vadd.f32 %v710_v20, %v550_v33  ;;  %v481_v54 = vadd.f32 %v480_v19, %v330_v14  ;;  %v201_v14 = vsub.s32 %v180_v36, %v200_v4  ;;  %v224_v19 = vadd.s32 18, %v190_v62 }
 0x16b   :  { %v639_v21 = vpop.f32.mrf.mxu0  ;;  %v4920_v22 = vpop.f32.mrf.mxu1 }
 0x16c   :  { %v714_v55 = vadd.f32 %v639_v21, %v479_v46  ;;  %v1705_v21 = vpop.permute.xlu0 %1704  ;;  %vm216_vm7 = vcmp.ne.s32.totalorder %v201_v14, 0  ;;  %vm219_vm15 = vcmp.lt.s32.totalorder %v201_v14, 0  ;;  %v4811_v22 = vld [vmem:[%s5763_s6 + $0x20] sm:$0xff] }
 0x16d   :  { %v641_v25 = vpop.f32.mrf.mxu0  ;;  %v874_v26 = vpop.f32.mrf.mxu1  ;;  %vm222_vm2 = vmand %vm219_vm15, %vm216_vm7 }
 0x16e   :  { %v880_v47 = vadd.f32 %v874_v26, %v716_v38  ;;  %v715_v63 = vadd.f32 %v641_v25, %v481_v54 }
 0x16f   :  { %v803_v27 = vpop.f32.mrf.mxu0  ;;  %v4925_v28 = vpop.f32.mrf.mxu1 }
 0x170   :  { %v878_v0 = vadd.f32 %v803_v27, %v714_v55  ;;  %v229_v27 = vsel %vm5370_vm3, %v226_v8, %v212_v60  ;;  %v3179_v60 = vld [vmem:[%s5762_s7] sm:$0xff] }
 0x171   :  { %v805_v34 = vpop.f32.mrf.mxu0  ;;  %vm5388_vm0 = vcmp.lt.s32.totalorder %v229_v27, 16 }
 0x172   :  { %v1038_v35 = vpop.f32.mrf.mxu1  ;;  %v879_v5 = vadd.f32 %v805_v34, %v715_v63  ;;  %v227_v34 = vsel %vm5375_vm5, %v224_v19, %v190_v62 }
 0x173   :  { %v967_v23 = vpop.f32.mrf.mxu0  ;;  %v1044_v56 = vadd.f32 %v1038_v35, %v880_v47  ;;  %vm5393_vm3 = vcmp.lt.s32.totalorder %v227_v34, 16  ;;  %v4817_v34 = vld [vmem:[%s5763_s6 + $0x30] sm:$0xff] }
 0x174   :  { %v4930_v37 = vpop.f32.mrf.mxu1  ;;  %v1042_v6 = vadd.f32 %v967_v23, %v878_v0  ;;  %v225_v23 = vadd.s32 18, %v201_v14 }
 0x175   :  { %v969_v42 = vpop.f32.mrf.mxu0 }
 0x176   :  { %v1202_v39 = vpop.f32.mrf.mxu1  ;;  %v1043_v9 = vadd.f32 %v969_v42, %v879_v5  ;;  %v228_v45 = vsel %vm222_vm2, %v225_v23, %v201_v14  ;;  %vm1739_vm2 = vcmask 154624   ;;  %v1753_v5 = vld [vmem:[%s5763_s6] sm:$0xff] }
 0x177   :  { %v1208_v1 = vadd.f32 %v1202_v39, %v1044_v56  ;;  %vm5405_vm15 = vcmp.lt.s32.totalorder %v228_v45, 16  ;;  %v4823_v45 = vld [vmem:[%s5763_s6 + $0x40] sm:$0xff] }
 0x178   :  { %v4935_v44 = vpop.f32.mrf.mxu1 }
 0x179   :  { %v1131_v48 = vpop.f32.mrf.mxu0 }
 0x17a   :  { %v1206_v10 = vadd.f32 %v1131_v48, %v1042_v6 }
 0x17b   :  { %v1133_v50 = vpop.f32.mrf.mxu0 }
 0x17c   :  { %v1366_v52 = vpop.f32.mrf.mxu1  ;;  %v1207_v15 = vadd.f32 %v1133_v50, %v1043_v9 }
 0x17d   :  { %v1372_v11 = vadd.f32 %v1366_v52, %v1208_v1  ;;  %v4800_v1 = vld [vmem:[%s5763_s6 + $0x8] sm:$0xff] }
 0x17e   :  { %v4940_v57 = vpop.f32.mrf.mxu1  ;;  %v1295_v59 = vpop.f32.mrf.mxu0 }
 0x17f   :  { %v1370_v16 = vadd.f32 %v1295_v59, %v1206_v10 }
 0x180   :  { %v1530_v61 = vpop.f32.mrf.mxu1  ;;  %v1297_v7 = vpop.f32.mrf.mxu0 }
 0x181   :  { %v1536_v17 = vadd.f32 %v1530_v61, %v1372_v11  ;;  %v1371_v24 = vadd.f32 %v1297_v7, %v1207_v15 }
 0x182   :  { %v4945_v2 = vpop.f32.mrf.mxu1 }
 0x185   :  { %v1459_v12 = vpop.f32.mrf.mxu0 }
 0x186   :  { %v1534_v25 = vadd.f32 %v1459_v12, %v1370_v16  ;;  %v4805_v12 = vld [vmem:[%s5763_s6 + $0x10] sm:$0xff] }
 0x187   :  { %v1461_v18 = vpop.f32.mrf.mxu0 }
 0x188   :  { %v1694_v20 = vpop.f32.mrf.mxu1  ;;  %v1535_v31 = vadd.f32 %v1461_v18, %v1371_v24 }
 0x189   :  { %v1700_v26 = vadd.f32 %v1694_v20, %v1536_v17  ;;  %v4808_v17 = vld [vmem:[%s5763_s6 + $0x18] sm:$0xff] }
 0x18a   :  { %v1623_v28 = vpop.f32.mrf.mxu0  ;;  %v4950_v30 = vpop.f32.mrf.mxu1 }
 0x18b   :  { %v1709_v32 = vadd.f32 %v1705_v21, %v1700_v26  ;;  %v1698_v33 = vadd.f32 %v1623_v28, %v1534_v25  ;;  %v4814_v28 = vld [vmem:[%s5763_s6 + $0x28] sm:$0xff] }
 0x18c   :  { %v1625_v35 = vpop.f32.mrf.mxu0 }
 0x18d   :  { %v1707_v37 = vadd.f32 %v1705_v21, %v1698_v33  ;;  %v1699_v38 = vadd.f32 %v1625_v35, %v1535_v31  ;;  %vm1712_vm1 = vcmp.ge.f32.partialorder %v1709_v32, 0.0  ;;  %v1717_v39 = vmul.f32 %v5384_v29, %v1709_v32 }
 0x18f   :  { %v1715_v41 = vmul.f32 %v5384_v29, %v1707_v37  ;;  %v1708_v42 = vadd.f32 %v1705_v21, %v1699_v38  ;;  %v1720_v43 = vsel %vm1712_vm1, %v1709_v32, %v1717_v39  ;;  %vm1710_vm5 = vcmp.ge.f32.partialorder %v1707_v37, 0.0  ;;  %v4820_v39 = vld [vmem:[%s5763_s6 + $0x38] sm:$0xff] }
 0x190   :  { %v1729_v44 = vsel %vm5388_vm0, %v1720_v43, 0.0  ;;  %vm1745_vm1 = vcmask 1047704  }
 0x191   :  { %v1716_v46 = vmul.f32 %v5384_v29, %v1708_v42  ;;  %1737 = vrot.lane.b32.xlu0 %v1729_v44, %s5078_s10  ;;  %v1718_v47 = vsel %vm1710_vm5, %v1707_v37, %v1715_v41  ;;  %vm1711_vm7 = vcmp.ge.f32.partialorder %v1708_v42, 0.0  ;;  %vm1748_vm5 = vcmask 416768  }
 0x192   :  { %v1727_v48 = vsel %vm5393_vm3, %v1718_v47, 0.0 }
 0x193   :  { %1733 = vrot.lane.b32.xlu1 %v1727_v48, %s5078_s10  ;;  %v1719_v51 = vsel %vm1711_vm7, %v1708_v42, %v1716_v46  ;;  %vm1770_vm7 = vcmask 64512  }
 0x194   :  { %v1728_v52 = vsel %vm5405_vm15, %v1719_v51, 0.0 }
 0x197   :  { %1735 = vrot.lane.b32.xlu1 %v1728_v52, %s5078_s10 }
 0x203   :  { %v1738_v54 = vpop.permute.xlu0 %1737 }
 0x205   :  { %v1734_v53 = vpop.permute.xlu1 %1733 }
 0x206   :  { %1746 = vst.msk [vmem:[#allocation2] sm:$0xff] %vm1745_vm1, %v1734_v53 }
 0x209   :  { %v1736_v55 = vpop.permute.xlu1 %1735 }
 0x20a   :  { %v1741_v56 = vsel %vm1739_vm2, %v1736_v55, %v1738_v54  ;;  %v1740_v59 = vsel %vm1739_vm2, %v1734_v53, %v1736_v55 }
 0x20b   :  { %1749 = vst.msk [vmem:[#allocation2 + $0x10] sm:$0xff] %vm1748_vm5, %v1741_v56 }
 0x20d   :  { %v1750_v57 = vld [vmem:[#allocation2] sm:$0xff] }
 0x20e   :  { %2061 = vrot.lane.b32.xlu0 %v1750_v57, %s5070_s1  ;;  %1759 = vrot.lane.b32.xlu1 %v1750_v57, %s5069_s0 }
 0x212   :  { %2381 = vrot.lane.b32.xlu0 %v1750_v57, %s5072_s20  ;;  %2221 = vrot.lane.b32.xlu1 %v1750_v57, %s5071_s19  ;;  %v1752_v58 = vld [vmem:[#allocation2 + $0x10] sm:$0xff] }
 0x216   :  { %2541 = vrot.lane.b32.xlu1 %v1750_v57, %s5073_s21  ;;  %1763 = vrot.lane.b32.xlu0 %v1752_v58, %s5069_s0 }
 0x21a   :  { %2701 = vrot.lane.b32.xlu0 %v1750_v57, %s5074_s22  ;;  %1761 = vrot.lane.b32.xlu1 %v1740_v59, %s5069_s0 }
 0x21e   :  { %2063 = vrot.lane.b32.xlu0 %v1740_v59, %s5070_s1  ;;  %2861 = vrot.lane.b32.xlu1 %v1750_v57, %s5076_s23 }
 0x222   :  { %2225 = vrot.lane.b32.xlu0 %v1752_v58, %s5071_s19  ;;  %2065 = vrot.lane.b32.xlu1 %v1752_v58, %s5070_s1 }
 0x226   :  { %2383 = vrot.lane.b32.xlu0 %v1740_v59, %s5072_s20  ;;  %2223 = vrot.lane.b32.xlu1 %v1740_v59, %s5071_s19 }
 0x22a   :  { %2545 = vrot.lane.b32.xlu0 %v1752_v58, %s5073_s21  ;;  %2385 = vrot.lane.b32.xlu1 %v1752_v58, %s5072_s20 }
 0x22e   :  { %2703 = vrot.lane.b32.xlu0 %v1740_v59, %s5074_s22  ;;  %2543 = vrot.lane.b32.xlu1 %v1740_v59, %s5073_s21 }
 0x232   :  { %2865 = vrot.lane.b32.xlu0 %v1752_v58, %s5076_s23  ;;  %2705 = vrot.lane.b32.xlu1 %v1752_v58, %s5074_s22 }
 0x236   :  { %3023 = vrot.lane.b32.xlu0 %v1740_v59, %s5077_s24  ;;  %2863 = vrot.lane.b32.xlu1 %v1740_v59, %s5076_s23 }
 0x23a   :  { %3021 = vrot.lane.b32.xlu0 %v1750_v57, %s5077_s24  ;;  %3025 = vrot.lane.b32.xlu1 %v1752_v58, %s5077_s24 }
 0x23e   :  { %3182 = vperm.xlu1 %5061, %v3179_v60  }
 0x280   :  { %v2062_v61 = vpop.permute.xlu0 %2061  ;;  %v1760_v62 = vpop.permute.xlu1 %1759 }
 0x284   :  { %v2382_v63 = vpop.permute.xlu0 %2381  ;;  %v2222_v0 = vpop.permute.xlu1 %2221 }
 0x288   :  { %v1764_v2 = vpop.permute.xlu0 %1763  ;;  %v5446_v4 = vpop.permute.xlu1 %2541 }
 0x289   :  { %4952 = vmatpush3.msra.mxu1 %v1764_v2 }
 0x28a   :  { %4956 = vmatprep.subr.mxu1 %v5066_v3  ;;  %4954 = vmatmul.mubr.msk.f32.vlgmr.msra.gmra.mxu1 %vm1770_vm7, %v4800_v1 }
 0x28b   :  { %4957 = vmatpush3.msra.mxu1 %v1752_v58  ;;  %4958 = vmatprep.mubr.msk.f32.mxu1 %vm5068_vm4, %v5066_v3 }
 0x28c   :  { %v5455_v6 = vpop.permute.xlu0 %2701  ;;  %v1762_v7 = vpop.permute.xlu1 %1761  ;;  %4961 = vmatprep.subr.mxu1 %v5066_v3 }
 0x28d   :  { %v1765_v8 = vsel %vm248_vm6, %v1760_v62, %v1762_v7  ;;  %v1766_v9 = vsel %vm248_vm6, %v1762_v7, %v1764_v2 }
 0x28e   :  { %1804 = vmatprep.subr.mxu0 %v1766_v9  ;;  %4959 = vmatmul.mubr.msk.f32.vlgmr.msra.gmra.mxu1 %vm1770_vm7, %v1753_v5 }
 0x28f   :  { %1805 = vmatpush1.msra.mxu0 %v1765_v8  ;;  %4963 = vmatprep.mubr.msk.f32.mxu1 %vm5068_vm4, %v5066_v3 }
 0x290   :  { %v2064_v10 = vpop.permute.xlu0 %2063  ;;  %4801 = vmatmul.mubr.msk.f32.vlgmr.msra.gmra.mxu0 %vm1770_vm7, %v4800_v1  ;;  %1948 = vmatprep.subr.mxu0 %v1740_v59  ;;  %v5464_v11 = vpop.permute.xlu1 %2861 }
 0x291   :  { %1949 = vmatpush1.msra.mxu0 %v1750_v57  ;;  %1982 = vmatprep.mubr.f32.mxu0 %v5066_v3  ;;  %v2067_v16 = vsel %vm561_vm8, %v2062_v61, %v2064_v10 }
 0x294   :  { %v2226_v13 = vpop.permute.xlu0 %2225  ;;  %4803 = vmatmul.mubr.msk.f32.vlgmr.msra.gmra.mxu0 %vm1770_vm7, %v1753_v5  ;;  %v2066_v14 = vpop.permute.xlu1 %2065 }
 0x295   :  { %4962 = vmatpush3.msra.mxu1 %v2066_v14  ;;  %v2068_v15 = vsel %vm561_vm8, %v2064_v10, %v2066_v14  ;;  %2139 = vmatprep.mubr.f32.mxu0 %v5066_v3 }
 0x296   :  { %2105 = vmatprep.subr.mxu0 %v2068_v15  ;;  %4964 = vmatmul.mubr.msk.f32.vlgmr.msra.gmra.mxu1 %vm1770_vm7, %v4805_v12 }
 0x297   :  { %4966 = vmatprep.subr.mxu1 %v5066_v3  ;;  %2106 = vmatpush1.msra.mxu0 %v2067_v16 }
 0x298   :  { %4967 = vmatpush3.msra.mxu1 %v2226_v13  ;;  %v2384_v18 = vpop.permute.xlu0 %2383  ;;  %4806 = vmatmul.mubr.msk.f32.vlgmr.msra.gmra.mxu0 %vm1770_vm7, %v4805_v12  ;;  %v2224_v19 = vpop.permute.xlu1 %2223 }
 0x299   :  { %v2227_v20 = vsel %vm725_vm9, %v2222_v0, %v2224_v19  ;;  %4968 = vmatprep.mubr.msk.f32.mxu1 %vm5068_vm4, %v5066_v3  ;;  %v2228_v21 = vsel %vm725_vm9, %v2224_v19, %v2226_v13  ;;  %2299 = vmatprep.mubr.f32.mxu0 %v5066_v3  ;;  %v2387_v27 = vsel %vm889_vm10, %v2382_v63, %v2384_v18 }
 0x29a   :  { %2265 = vmatprep.subr.mxu0 %v2228_v21  ;;  %4969 = vmatmul.mubr.msk.f32.vlgmr.msra.gmra.mxu1 %vm1770_vm7, %v4808_v17 }
 0x29b   :  { %2266 = vmatpush1.msra.mxu0 %v2227_v20  ;;  %4971 = vmatprep.subr.mxu1 %v5066_v3 }
 0x29c   :  { %v2546_v24 = vpop.permute.xlu0 %2545  ;;  %4809 = vmatmul.mubr.msk.f32.vlgmr.msra.gmra.mxu0 %vm1770_vm7, %v4808_v17  ;;  %v2386_v25 = vpop.permute.xlu1 %2385  ;;  %4973 = vmatprep.mubr.msk.f32.mxu1 %vm5068_vm4, %v5066_v3 }
 0x29d   :  { %4972 = vmatpush3.msra.mxu1 %v2386_v25  ;;  %v2388_v26 = vsel %vm889_vm10, %v2384_v18, %v2386_v25  ;;  %2459 = vmatprep.mubr.f32.mxu0 %v5066_v3 }
 0x29e   :  { %2425 = vmatprep.subr.mxu0 %v2388_v26  ;;  %4974 = vmatmul.mubr.msk.f32.vlgmr.msra.gmra.mxu1 %vm1770_vm7, %v4811_v22 }
 0x29f   :  { %4976 = vmatprep.subr.mxu1 %v5066_v3  ;;  %2426 = vmatpush1.msra.mxu0 %v2387_v27 }
 0x2a0   :  { %4977 = vmatpush3.msra.mxu1 %v2546_v24  ;;  %v2704_v30 = vpop.permute.xlu0 %2703  ;;  %4812 = vmatmul.mubr.msk.f32.vlgmr.msra.gmra.mxu0 %vm1770_vm7, %v4811_v22  ;;  %v2544_v31 = vpop.permute.xlu1 %2543 }
 0x2a1   :  { %v2547_v32 = vsel %vm1053_vm11, %v5446_v4, %v2544_v31  ;;  %4978 = vmatprep.mubr.msk.f32.mxu1 %vm5068_vm4, %v5066_v3  ;;  %v2548_v33 = vsel %vm1053_vm11, %v2544_v31, %v2546_v24  ;;  %2619 = vmatprep.mubr.f32.mxu0 %v5066_v3  ;;  %v2707_v38 = vsel %vm5770_vm12, %v5455_v6, %v2704_v30 }
 0x2a2   :  { %2585 = vmatprep.subr.mxu0 %v2548_v33  ;;  %4979 = vmatmul.mubr.msk.f32.vlgmr.msra.gmra.mxu1 %vm1770_vm7, %v4814_v28 }
 0x2a3   :  { %2586 = vmatpush1.msra.mxu0 %v2547_v32  ;;  %4981 = vmatprep.subr.mxu1 %v5066_v3 }
 0x2a4   :  { %v2866_v35 = vpop.permute.xlu0 %2865  ;;  %4815 = vmatmul.mubr.msk.f32.vlgmr.msra.gmra.mxu0 %vm1770_vm7, %v4814_v28  ;;  %v2706_v23 = vpop.permute.xlu1 %2705  ;;  %4983 = vmatprep.mubr.msk.f32.mxu1 %vm5068_vm4, %v5066_v3 }
 0x2a5   :  { %4982 = vmatpush3.msra.mxu1 %v2706_v23  ;;  %v2708_v37 = vsel %vm5770_vm12, %v2704_v30, %v2706_v23  ;;  %2779 = vmatprep.mubr.f32.mxu0 %v5066_v3 }
 0x2a6   :  { %2745 = vmatprep.subr.mxu0 %v2708_v37  ;;  %4984 = vmatmul.mubr.msk.f32.vlgmr.msra.gmra.mxu1 %vm1770_vm7, %v4817_v34 }
 0x2a7   :  { %4986 = vmatprep.subr.mxu1 %v5066_v3  ;;  %2746 = vmatpush1.msra.mxu0 %v2707_v38 }
 0x2a8   :  { %4987 = vmatpush3.msra.mxu1 %v2866_v35  ;;  %v3024_v41 = vpop.permute.xlu0 %3023  ;;  %4818 = vmatmul.mubr.msk.f32.vlgmr.msra.gmra.mxu0 %vm1770_vm7, %v4817_v34  ;;  %v2864_v42 = vpop.permute.xlu1 %2863 }
 0x2a9   :  { %v2867_v43 = vsel %vm5769_vm13, %v5464_v11, %v2864_v42  ;;  %4988 = vmatprep.mubr.msk.f32.mxu1 %vm5068_vm4, %v5066_v3  ;;  %v2868_v44 = vsel %vm5769_vm13, %v2864_v42, %v2866_v35  ;;  %2939 = vmatprep.mubr.f32.mxu0 %v5066_v3 }
 0x2aa   :  { %2905 = vmatprep.subr.mxu0 %v2868_v44  ;;  %4989 = vmatmul.mubr.msk.f32.vlgmr.msra.gmra.mxu1 %vm1770_vm7, %v4820_v39 }
 0x2ab   :  { %2906 = vmatpush1.msra.mxu0 %v2867_v43  ;;  %4991 = vmatprep.subr.mxu1 %v5066_v3 }
 0x2ac   :  { %v3022_v46 = vpop.permute.xlu0 %3021  ;;  %4821 = vmatmul.mubr.msk.f32.vlgmr.msra.gmra.mxu0 %vm1770_vm7, %v4820_v39  ;;  %v3026_v47 = vpop.permute.xlu1 %3025  ;;  %4993 = vmatprep.mubr.msk.f32.mxu1 %vm5068_vm4, %v5066_v3 }
 0x2ad   :  { %v3027_v48 = vsel %vm5768_vm14, %v3022_v46, %v3024_v41  ;;  %4992 = vmatpush3.msra.mxu1 %v3026_v47  ;;  %v3028_v51 = vsel %vm5768_vm14, %v3024_v41, %v3026_v47  ;;  %3099 = vmatprep.mubr.f32.mxu0 %v5066_v3 }
 0x2ae   :  { %3065 = vmatprep.subr.mxu0 %v3028_v51  ;;  %4994 = vmatmul.mubr.msk.f32.vlgmr.msra.gmra.mxu1 %vm1770_vm7, %v4823_v45 }
 0x2af   :  { %3066 = vmatpush1.msra.mxu0 %v3027_v48  ;;  %4996 = vmatprep.subr.mxu1 %v5066_v3 }
 0x2b0   :  { %4824 = vmatmul.mubr.msk.f32.vlgmr.msra.gmra.mxu0 %vm1770_vm7, %v4823_v45  ;;  %4998 = vmatprep.mubr.msk.f32.mxu1 %vm5068_vm4, %v5066_v3 }
 0x2b1   :  { %3306 = vmatprep.mubr.f32.mxu0 %v5066_v3 }
 0x2b9   :  { %v3183_v41 = vpop.permute.xlu1 %3182 }
 0x34a   :  { %v1911_v52 = vpop.f32.mrf.mxu1 }
 0x34c   :  { %v4955_v53 = vpop.f32.mrf.mxu1 }
 0x34e   :  { %v2055_v54 = vpop.f32.mrf.mxu1 }
 0x34f   :  { %v2056_v1 = vadd.f32 %v2055_v54, %v1911_v52 }
 0x350   :  { %v1840_v55 = vpop.f32.mrf.mxu0  ;;  %v4960_v56 = vpop.f32.mrf.mxu1 }
 0x352   :  { %v1842_v57 = vpop.f32.mrf.mxu0 }
 0x354   :  { %v1984_v58 = vpop.f32.mrf.mxu0 }
 0x355   :  { %v1985_v12 = vadd.f32 %v1984_v58, %v1840_v55 }
 0x356   :  { %v1986_v59 = vpop.f32.mrf.mxu0  ;;  %v2212_v60 = vpop.f32.mrf.mxu1 }
 0x357   :  { %v2218_v7 = vadd.f32 %v2212_v60, %v2056_v1  ;;  %v1987_v16 = vadd.f32 %v1986_v59, %v1842_v57 }
 0x358   :  { %v2141_v61 = vpop.f32.mrf.mxu0  ;;  %v4965_v62 = vpop.f32.mrf.mxu1 }
 0x359   :  { %v2216_v17 = vadd.f32 %v2141_v61, %v1985_v12 }
 0x35a   :  { %v2143_v63 = vpop.f32.mrf.mxu0  ;;  %v2372_v0 = vpop.f32.mrf.mxu1 }
 0x35b   :  { %v2378_v13 = vadd.f32 %v2372_v0, %v2218_v7  ;;  %v2217_v20 = vadd.f32 %v2143_v63, %v1987_v16  ;;  %v4647_v7 = vld [vmem:[%s5764_s9] sm:$0x3] }
 0x35c   :  { %v2301_v2 = vpop.f32.mrf.mxu0  ;;  %v4970_v4 = vpop.f32.mrf.mxu1 }
 0x35d   :  { %v2376_v21 = vadd.f32 %v2301_v2, %v2216_v17 }
 0x35e   :  { %v2303_v5 = vpop.f32.mrf.mxu0  ;;  %v2532_v6 = vpop.f32.mrf.mxu1 }
 0x35f   :  { %v2538_v22 = vadd.f32 %v2532_v6, %v2378_v13  ;;  %v2377_v26 = vadd.f32 %v2303_v5, %v2217_v20  ;;  %v5065_v13 = vld [vmem:[%s5758_s3 + $0x8] sm:$0xf] }
 0x360   :  { %v2461_v8 = vpop.f32.mrf.mxu0  ;;  %v4975_v9 = vpop.f32.mrf.mxu1 }
 0x361   :  { %v2536_v27 = vadd.f32 %v2461_v8, %v2376_v21  ;;  %v5062_v8 = vld [vmem:[%s5757_s2] sm:$0xff] }
 0x362   :  { %v2463_v10 = vpop.f32.mrf.mxu0  ;;  %v2692_v11 = vpop.f32.mrf.mxu1  ;;  %v4670_v9 = vcombine.high %v5062_v8, %v5062_v8  ;;  %v3222_v21 = vld [vmem:[%s5765_s8] sm:$0x3] }
 0x363   :  { %v2698_v28 = vadd.f32 %v2692_v11, %v2538_v22  ;;  %v2537_v32 = vadd.f32 %v2463_v10, %v2377_v26  ;;  %v5063_v10 = vld [vmem:[%s5757_s2 + $0x8] sm:$0xf]  ;;  %v5064_v11 = vld [vmem:[%s5758_s3] sm:$0xff] }
 0x364   :  { %v2621_v14 = vpop.f32.mrf.mxu0  ;;  %v4980_v15 = vpop.f32.mrf.mxu1  ;;  %v4699_v12 = vcombine.high %v5064_v11, %v5064_v11 }
 0x365   :  { %v2696_v33 = vadd.f32 %v2621_v14, %v2536_v27 }
 0x366   :  { %v2623_v18 = vpop.f32.mrf.mxu0  ;;  %v2852_v19 = vpop.f32.mrf.mxu1 }
 0x367   :  { %v2858_v34 = vadd.f32 %v2852_v19, %v2698_v28  ;;  %v2697_v37 = vadd.f32 %v2623_v18, %v2537_v32  ;;  %v4826_v18 = vld [vmem:[%s5765_s8 + $0x2] sm:$0x3] }
 0x368   :  { %v2781_v24 = vpop.f32.mrf.mxu0  ;;  %v4985_v25 = vpop.f32.mrf.mxu1 }
 0x369   :  { %v2856_v38 = vadd.f32 %v2781_v24, %v2696_v33 }
 0x36a   :  { %v2783_v30 = vpop.f32.mrf.mxu0  ;;  %v3012_v31 = vpop.f32.mrf.mxu1 }
 0x36b   :  { %v3018_v39 = vadd.f32 %v3012_v31, %v2858_v34  ;;  %v2857_v44 = vadd.f32 %v2783_v30, %v2697_v37  ;;  %v4831_v30 = vld [vmem:[%s5765_s8 + $0x4] sm:$0x3] }
 0x36c   :  { %v2941_v35 = vpop.f32.mrf.mxu0  ;;  %v4990_v23 = vpop.f32.mrf.mxu1 }
 0x36d   :  { %v3016_v45 = vadd.f32 %v2941_v35, %v2856_v38  ;;  %v4834_v35 = vld [vmem:[%s5765_s8 + $0x6] sm:$0x3] }
 0x36e   :  { %v2943_v42 = vpop.f32.mrf.mxu0  ;;  %v3172_v43 = vpop.f32.mrf.mxu1 }
 0x36f   :  { %v3178_v46 = vadd.f32 %v3172_v43, %v3018_v39  ;;  %v3017_v51 = vadd.f32 %v2943_v42, %v2857_v44 }
 0x370   :  { %v3101_v47 = vpop.f32.mrf.mxu0  ;;  %v4995_v48 = vpop.f32.mrf.mxu1 }
 0x371   :  { %v3176_v52 = vadd.f32 %v3101_v47, %v3016_v45  ;;  %v3187_v53 = vadd.f32 %v3183_v41, %v3178_v46  ;;  %v4840_v46 = vld [vmem:[%s5765_s8 + $0xa] sm:$0x3] }
 0x372   :  { %v3103_v54 = vpop.f32.mrf.mxu0 }
 0x373   :  { %v3185_v55 = vadd.f32 %v3183_v41, %v3176_v52  ;;  %v3177_v56 = vadd.f32 %v3103_v54, %v3017_v51  ;;  %v3195_v59 = vmul.f32 %v3187_v53, %v5384_v29  ;;  %vm3190_vm13 = vcmp.ge.f32.partialorder %v3187_v53, 0.0 }
 0x375   :  { %v3186_v57 = vadd.f32 %v3183_v41, %v3177_v56  ;;  %vm3188_vm14 = vcmp.ge.f32.partialorder %v3185_v55, 0.0  ;;  %v3193_v58 = vmul.f32 %v3185_v55, %v5384_v29  ;;  %v3198_v0 = vsel %vm3190_vm13, %v3187_v53, %v3195_v59  ;;  %v4837_v41 = vld [vmem:[%s5765_s8 + $0x8] sm:$0x3]  ;;  %v4843_v53 = vld [vmem:[%s5765_s8 + $0xc] sm:$0x3] }
 0x376   :  { %v3201_v2 = vsel %vm5388_vm0, %v3198_v0, 0.0 }
 0x377   :  { %v3194_v60 = vmul.f32 %v3186_v57, %v5384_v29  ;;  %v3196_v61 = vsel %vm3188_vm14, %v3185_v55, %v3193_v58  ;;  %vm3189_vm12 = vcmp.ge.f32.partialorder %v3186_v57, 0.0  ;;  %v4846_v58 = vld [vmem:[%s5765_s8 + $0xe] sm:$0x3] }
 0x378   :  { %v3199_v62 = vsel %vm5393_vm3, %v3196_v61, 0.0 }
 0x379   :  { %3205 = vrot.lane.b32.xlu0 %v3199_v62, %s5078_s10  ;;  %v3197_v63 = vsel %vm3189_vm12, %v3186_v57, %v3194_v60  ;;  %vm5785_vm12 = vcmask 736256  }
 0x37a   :  { %v3200_v1 = vsel %vm5405_vm15, %v3197_v63, 0.0  ;;  %v4849_v63 = vld [vmem:[%s5765_s8 + $0x10] sm:$0x3]  ;;  %vm5786_vm13 = vmmov %vm5785_vm12 }
 0x37b   :  { %3207 = vrot.lane.b32.xlu1 %v3200_v1, %s5078_s10 }
 0x37d   :  { %3209 = vrot.lane.b32.xlu0 %v3201_v2, %s5078_s10 }
 0x3eb   :  { %v3206_v29 = vpop.permute.xlu0 %3205 }
 0x3ec   :  { %3216 = vst.msk [vmem:[#allocation2] sm:$0xff] %vm1745_vm1, %v3206_v29 }
 0x3ed   :  { %v3208_v4 = vpop.permute.xlu1 %3207 }
 0x3ee   :  { %v5563_v40 = vsel %vm1739_vm2, %v3206_v29, %v3208_v4 }
 0x3ef   :  { %3217 = vst [vmem:[#allocation2 + $0x8] sm:$0xff] %v5563_v40  ;;  %v3210_v5 = vpop.permute.xlu0 %3209 }
 0x3f0   :  { %v3212_v50 = vsel %vm1739_vm2, %v3208_v4, %v3210_v5 }
 0x3f1   :  { %3218 = vst.msk [vmem:[#allocation2 + $0x10] sm:$0xff] %vm1748_vm5, %v3212_v50 }
 0x3f3   :  { %v5568_v6 = vld [vmem:[#allocation2] sm:$0xff] }
 0x3f4   :  { %3529 = vrot.lane.b32.xlu0 %v5568_v6, %s5070_s1  ;;  %3228 = vrot.lane.b32.xlu1 %v5568_v6, %s5069_s0 }
 0x3f8   :  { %3849 = vrot.lane.b32.xlu0 %v5568_v6, %s5072_s20  ;;  %3689 = vrot.lane.b32.xlu1 %v5568_v6, %s5071_s19  ;;  %v3221_v36 = vld [vmem:[#allocation2 + $0x10] sm:$0xff] }
 0x3fc   :  { %4009 = vrot.lane.b32.xlu1 %v5568_v6, %s5073_s21  ;;  %3232 = vrot.lane.b32.xlu0 %v3221_v36, %s5069_s0 }
 0x400   :  { %3230 = vrot.lane.b32.xlu1 %v5563_v40, %s5069_s0  ;;  %4169 = vrot.lane.b32.xlu0 %v5568_v6, %s5074_s22 }
 0x404   :  { %4329 = vrot.lane.b32.xlu1 %v5568_v6, %s5076_s23  ;;  %3531 = vrot.lane.b32.xlu0 %v5563_v40, %s5070_s1 }
 0x408   :  { %3533 = vrot.lane.b32.xlu1 %v3221_v36, %s5070_s1  ;;  %3693 = vrot.lane.b32.xlu0 %v3221_v36, %s5071_s19 }
 0x40c   :  { %3691 = vrot.lane.b32.xlu1 %v5563_v40, %s5071_s19  ;;  %3851 = vrot.lane.b32.xlu0 %v5563_v40, %s5072_s20 }
 0x410   :  { %3853 = vrot.lane.b32.xlu1 %v3221_v36, %s5072_s20  ;;  %4013 = vrot.lane.b32.xlu0 %v3221_v36, %s5073_s21 }
 0x414   :  { %4011 = vrot.lane.b32.xlu1 %v5563_v40, %s5073_s21  ;;  %4171 = vrot.lane.b32.xlu0 %v5563_v40, %s5074_s22 }
 0x418   :  { %4173 = vrot.lane.b32.xlu1 %v3221_v36, %s5074_s22  ;;  %4333 = vrot.lane.b32.xlu0 %v3221_v36, %s5076_s23 }
 0x41c   :  { %4331 = vrot.lane.b32.xlu1 %v5563_v40, %s5076_s23  ;;  %4491 = vrot.lane.b32.xlu0 %v5563_v40, %s5077_s24 }
 0x420   :  { %4493 = vrot.lane.b32.xlu1 %v3221_v36, %s5077_s24  ;;  %4489 = vrot.lane.b32.xlu0 %v5568_v6, %s5077_s24 }
 0x424   :  { %4650 = vperm.xlu1 %5061, %v4647_v7   ;;  %4671 = vrot.lane.b32.xlu0 %v5062_v8, %s5072_s20 }
 0x428   :  { %4673 = vrot.lane.b32.xlu1 %v4670_v9, %s5072_s20  ;;  %4675 = vrot.lane.b32.xlu0 %v5063_v10, %s5072_s20 }
 0x42c   :  { %4700 = vrot.lane.b32.xlu1 %v5064_v11, %s5072_s20  ;;  %4702 = vrot.lane.b32.xlu0 %v4699_v12, %s5072_s20 }
 0x430   :  { %4704 = vrot.lane.b32.xlu1 %v5065_v13, %s5072_s20 }
 0x466   :  { %v3229_v14 = vpop.permute.xlu1 %3228  ;;  %v3530_v15 = vpop.permute.xlu0 %3529 }
 0x46a   :  { %v3690_v16 = vpop.permute.xlu1 %3689  ;;  %v3850_v17 = vpop.permute.xlu0 %3849 }
 0x46e   :  { %v5634_v19 = vpop.permute.xlu1 %4009  ;;  %v3233_v20 = vpop.permute.xlu0 %3232 }
 0x46f   :  { %4997 = vmatpush3.msra.mxu1 %v3233_v20 }
 0x470   :  { %5001 = vmatprep.subr.mxu1 %v5066_v3  ;;  %4999 = vmatmul.mubr.msk.f32.vlgmr.msra.gmra.mxu1 %vm1770_vm7, %v4826_v18 }
 0x471   :  { %5002 = vmatpush3.msra.mxu1 %v3221_v36  ;;  %5003 = vmatprep.mubr.msk.f32.mxu1 %vm5068_vm4, %v5066_v3 }
 0x472   :  { %v3231_v22 = vpop.permute.xlu1 %3230  ;;  %v5643_v24 = vpop.permute.xlu0 %4169  ;;  %5006 = vmatprep.subr.mxu1 %v5066_v3 }
 0x473   :  { %v3234_v25 = vsel %vm248_vm6, %v3229_v14, %v3231_v22  ;;  %v3235_v26 = vsel %vm248_vm6, %v3231_v22, %v3233_v20  ;;  %vm5781_vm6 = vcmask 752640  }
 0x474   :  { %3272 = vmatprep.subr.mxu0 %v3235_v26  ;;  %5004 = vmatmul.mubr.msk.f32.vlgmr.msra.gmra.mxu1 %vm1770_vm7, %v3222_v21 }
 0x475   :  { %3273 = vmatpush1.msra.mxu0 %v3234_v25  ;;  %5008 = vmatprep.mubr.msk.f32.mxu1 %vm5068_vm4, %v5066_v3 }
 0x476   :  { %v5651_v27 = vpop.permute.xlu1 %4329  ;;  %4827 = vmatmul.mubr.msk.f32.vlgmr.msra.gmra.mxu0 %vm1770_vm7, %v4826_v18  ;;  %3416 = vmatprep.subr.mxu0 %v5563_v40  ;;  %v3532_v28 = vpop.permute.xlu0 %3531 }
 0x477   :  { %3417 = vmatpush1.msra.mxu0 %v5568_v6  ;;  %3450 = vmatprep.mubr.f32.mxu0 %v5066_v3  ;;  %v3535_v34 = vsel %vm561_vm8, %v3530_v15, %v3532_v28 }
 0x47a   :  { %v3534_v31 = vpop.permute.xlu1 %3533  ;;  %4829 = vmatmul.mubr.msk.f32.vlgmr.msra.gmra.mxu0 %vm1770_vm7, %v3222_v21  ;;  %v3694_v32 = vpop.permute.xlu0 %3693 }
 0x47b   :  { %5007 = vmatpush3.msra.mxu1 %v3534_v31  ;;  %v3536_v33 = vsel %vm561_vm8, %v3532_v28, %v3534_v31  ;;  %3607 = vmatprep.mubr.f32.mxu0 %v5066_v3  ;;  %vm5782_vm8 = vmmov %vm5781_vm6 }
 0x47c   :  { %3573 = vmatprep.subr.mxu0 %v3536_v33  ;;  %5009 = vmatmul.mubr.msk.f32.vlgmr.msra.gmra.mxu1 %vm1770_vm7, %v4831_v30 }
 0x47d   :  { %5011 = vmatprep.subr.mxu1 %v5066_v3  ;;  %3574 = vmatpush1.msra.mxu0 %v3535_v34 }
 0x47e   :  { %5012 = vmatpush3.msra.mxu1 %v3694_v32  ;;  %v3692_v23 = vpop.permute.xlu1 %3691  ;;  %4832 = vmatmul.mubr.msk.f32.vlgmr.msra.gmra.mxu0 %vm1770_vm7, %v4831_v30  ;;  %v3852_v37 = vpop.permute.xlu0 %3851 }
 0x47f   :  { %v3695_v38 = vsel %vm725_vm9, %v3690_v16, %v3692_v23  ;;  %5013 = vmatprep.mubr.msk.f32.mxu1 %vm5068_vm4, %v5066_v3  ;;  %v3696_v39 = vsel %vm725_vm9, %v3692_v23, %v3694_v32  ;;  %3767 = vmatprep.mubr.f32.mxu0 %v5066_v3  ;;  %v3855_v45 = vsel %vm889_vm10, %v3850_v17, %v3852_v37  ;;  %vm5783_vm9 = vcmask 744448  }
 0x480   :  { %3733 = vmatprep.subr.mxu0 %v3696_v39  ;;  %5014 = vmatmul.mubr.msk.f32.vlgmr.msra.gmra.mxu1 %vm1770_vm7, %v4834_v35 }
 0x481   :  { %3734 = vmatpush1.msra.mxu0 %v3695_v38  ;;  %5016 = vmatprep.subr.mxu1 %v5066_v3 }
 0x482   :  { %v3854_v42 = vpop.permute.xlu1 %3853  ;;  %4835 = vmatmul.mubr.msk.f32.vlgmr.msra.gmra.mxu0 %vm1770_vm7, %v4834_v35  ;;  %v4014_v43 = vpop.permute.xlu0 %4013  ;;  %5018 = vmatprep.mubr.msk.f32.mxu1 %vm5068_vm4, %v5066_v3 }
 0x483   :  { %5017 = vmatpush3.msra.mxu1 %v3854_v42  ;;  %v3856_v44 = vsel %vm889_vm10, %v3852_v37, %v3854_v42  ;;  %3927 = vmatprep.mubr.f32.mxu0 %v5066_v3 }
 0x484   :  { %3893 = vmatprep.subr.mxu0 %v3856_v44  ;;  %5019 = vmatmul.mubr.msk.f32.vlgmr.msra.gmra.mxu1 %vm1770_vm7, %v4837_v41 }
 0x485   :  { %5021 = vmatprep.subr.mxu1 %v5066_v3  ;;  %3894 = vmatpush1.msra.mxu0 %v3855_v45 }
 0x486   :  { %5022 = vmatpush3.msra.mxu1 %v4014_v43  ;;  %v4012_v47 = vpop.permute.xlu1 %4011  ;;  %4838 = vmatmul.mubr.msk.f32.vlgmr.msra.gmra.mxu0 %vm1770_vm7, %v4837_v41  ;;  %v4172_v48 = vpop.permute.xlu0 %4171 }
 0x487   :  { %v4015_v51 = vsel %vm1053_vm11, %v5634_v19, %v4012_v47  ;;  %5023 = vmatprep.mubr.msk.f32.mxu1 %vm5068_vm4, %v5066_v3  ;;  %v4016_v52 = vsel %vm1053_vm11, %v4012_v47, %v4014_v43  ;;  %4087 = vmatprep.mubr.f32.mxu0 %v5066_v3  ;;  %v4175_v57 = vsel %vm5782_vm8, %v5643_v24, %v4172_v48  ;;  %vm5784_vm11 = vmmov %vm5783_vm9 }
 0x488   :  { %4053 = vmatprep.subr.mxu0 %v4016_v52  ;;  %5024 = vmatmul.mubr.msk.f32.vlgmr.msra.gmra.mxu1 %vm1770_vm7, %v4840_v46 }
 0x489   :  { %4054 = vmatpush1.msra.mxu0 %v4015_v51  ;;  %5026 = vmatprep.subr.mxu1 %v5066_v3 }
 0x48a   :  { %v4174_v54 = vpop.permute.xlu1 %4173  ;;  %4841 = vmatmul.mubr.msk.f32.vlgmr.msra.gmra.mxu0 %vm1770_vm7, %v4840_v46  ;;  %v4334_v55 = vpop.permute.xlu0 %4333  ;;  %5028 = vmatprep.mubr.msk.f32.mxu1 %vm5068_vm4, %v5066_v3 }
 0x48b   :  { %5027 = vmatpush3.msra.mxu1 %v4174_v54  ;;  %v4176_v56 = vsel %vm5781_vm6, %v4172_v48, %v4174_v54  ;;  %4247 = vmatprep.mubr.f32.mxu0 %v5066_v3 }
 0x48c   :  { %4213 = vmatprep.subr.mxu0 %v4176_v56  ;;  %5029 = vmatmul.mubr.msk.f32.vlgmr.msra.gmra.mxu1 %vm1770_vm7, %v4843_v53 }
 0x48d   :  { %5031 = vmatprep.subr.mxu1 %v5066_v3  ;;  %4214 = vmatpush1.msra.mxu0 %v4175_v57 }
 0x48e   :  { %5032 = vmatpush3.msra.mxu1 %v4334_v55  ;;  %v4332_v59 = vpop.permute.xlu1 %4331  ;;  %4844 = vmatmul.mubr.msk.f32.vlgmr.msra.gmra.mxu0 %vm1770_vm7, %v4843_v53  ;;  %v4492_v60 = vpop.permute.xlu0 %4491 }
 0x48f   :  { %v4335_v61 = vsel %vm5783_vm9, %v5651_v27, %v4332_v59  ;;  %5033 = vmatprep.mubr.msk.f32.mxu1 %vm5068_vm4, %v5066_v3  ;;  %v4336_v62 = vsel %vm5784_vm11, %v4332_v59, %v4334_v55  ;;  %4407 = vmatprep.mubr.f32.mxu0 %v5066_v3 }
 0x490   :  { %4373 = vmatprep.subr.mxu0 %v4336_v62  ;;  %5034 = vmatmul.mubr.msk.f32.vlgmr.msra.gmra.mxu1 %vm1770_vm7, %v4846_v58 }
 0x491   :  { %4374 = vmatpush1.msra.mxu0 %v4335_v61  ;;  %5036 = vmatprep.subr.mxu1 %v5066_v3  ;;  %v4658_v61 = vsub.s32 0, %v5178_v49 }
 0x492   :  { %v4494_v0 = vpop.permute.xlu1 %4493  ;;  %4847 = vmatmul.mubr.msk.f32.vlgmr.msra.gmra.mxu0 %vm1770_vm7, %v4846_v58  ;;  %v4490_v1 = vpop.permute.xlu0 %4489  ;;  %5038 = vmatprep.mubr.msk.f32.mxu1 %vm5068_vm4, %v5066_v3  ;;  %vm4722_vm4 = vcmask 257024  }
 0x493   :  { %v4495_v2 = vsel %vm5785_vm12, %v4490_v1, %v4492_v60  ;;  %5037 = vmatpush3.msra.mxu1 %v4494_v0  ;;  %v4496_v29 = vsel %vm5786_vm13, %v4492_v60, %v4494_v0  ;;  %4567 = vmatprep.mubr.f32.mxu0 %v5066_v3  ;;  %v4687_v1 = vsub.s32 1, %v5178_v49 }
 0x494   :  { %4533 = vmatprep.subr.mxu0 %v4496_v29  ;;  %5039 = vmatmul.mubr.msk.f32.vlgmr.msra.gmra.mxu1 %vm1770_vm7, %v4849_v63 }
 0x495   :  { %4534 = vmatpush1.msra.mxu0 %v4495_v2 }
 0x496   :  { %4850 = vmatmul.mubr.msk.f32.vlgmr.msra.gmra.mxu0 %vm1770_vm7, %v4849_v63  ;;  %v4672_v32 = vpop.permute.xlu0 %4671 }
 0x49a   :  { %v4676_v52 = vpop.permute.xlu0 %4675 }
 0x49f   :  { %v4651_v22 = vpop.permute.xlu1 %4650 }
 0x4a3   :  { %v4674_v38 = vpop.permute.xlu1 %4673 }
 0x4a7   :  { %v4701_v58 = vpop.permute.xlu1 %4700 }
 0x530   :  { %v3379_v4 = vpop.f32.mrf.mxu1 }
 0x532   :  { %v5000_v40 = vpop.f32.mrf.mxu1 }
 0x534   :  { %v3523_v5 = vpop.f32.mrf.mxu1 }
 0x535   :  { %v3524_v17 = vadd.f32 %v3523_v5, %v3379_v4 }
 0x536   :  { %v3308_v50 = vpop.f32.mrf.mxu0  ;;  %v5005_v6 = vpop.f32.mrf.mxu1 }
 0x538   :  { %v3310_v36 = vpop.f32.mrf.mxu0 }
 0x53a   :  { %v3452_v7 = vpop.f32.mrf.mxu0 }
 0x53b   :  { %v3453_v24 = vadd.f32 %v3452_v7, %v3308_v50  ;;  %v4703_v50 = vpop.permute.xlu0 %4702 }
 0x53c   :  { %v3454_v8 = vpop.f32.mrf.mxu0  ;;  %v3680_v9 = vpop.f32.mrf.mxu1 }
 0x53d   :  { %v3686_v25 = vadd.f32 %v3680_v9, %v3524_v17  ;;  %v3455_v28 = vadd.f32 %v3454_v8, %v3310_v36 }
 0x53e   :  { %v3609_v10 = vpop.f32.mrf.mxu0  ;;  %v5010_v11 = vpop.f32.mrf.mxu1 }
 0x53f   :  { %v3684_v30 = vadd.f32 %v3609_v10, %v3453_v24  ;;  %v4705_v10 = vpop.permute.xlu1 %4704  ;;  %v4677_v11 = vsel %vm889_vm10, %v4672_v32, %v4674_v38 }
 0x540   :  { %v3611_v12 = vpop.f32.mrf.mxu0  ;;  %v3840_v13 = vpop.f32.mrf.mxu1 }
 0x541   :  { %v3846_v31 = vadd.f32 %v3840_v13, %v3686_v25  ;;  %v3685_v35 = vadd.f32 %v3611_v12, %v3455_v28  ;;  %v4706_v12 = vsel %vm889_vm10, %v4701_v58, %v4703_v50 }
 0x542   :  { %v3769_v3 = vpop.f32.mrf.mxu0  ;;  %v5015_v14 = vpop.f32.mrf.mxu1 }
 0x543   :  { %v3844_v23 = vadd.f32 %v3769_v3, %v3684_v30  ;;  %v4678_v30 = vsel %vm889_vm10, %v4674_v38, %v4676_v52 }
 0x544   :  { %v3771_v15 = vpop.f32.mrf.mxu0  ;;  %v4000_v16 = vpop.f32.mrf.mxu1 }
 0x545   :  { %v4006_v37 = vadd.f32 %v4000_v16, %v3846_v31  ;;  %v3845_v42 = vadd.f32 %v3771_v15, %v3685_v35 }
 0x546   :  { %v3929_v18 = vpop.f32.mrf.mxu0  ;;  %v5020_v19 = vpop.f32.mrf.mxu1 }
 0x547   :  { %v4004_v43 = vadd.f32 %v3929_v18, %v3844_v23  ;;  %v4707_v18 = vsel %vm889_vm10, %v4703_v50, %v4705_v10 }
 0x548   :  { %v3931_v20 = vpop.f32.mrf.mxu0  ;;  %v4160_v21 = vpop.f32.mrf.mxu1 }
 0x549   :  { %v4166_v44 = vadd.f32 %v4160_v21, %v4006_v37  ;;  %v4005_v47 = vadd.f32 %v3931_v20, %v3845_v42 }
 0x54a   :  { %v4089_v26 = vpop.f32.mrf.mxu0  ;;  %v5025_v27 = vpop.f32.mrf.mxu1 }
 0x54b   :  { %v4164_v48 = vadd.f32 %v4089_v26, %v4004_v43 }
 0x54c   :  { %v4091_v33 = vpop.f32.mrf.mxu0  ;;  %v4320_v34 = vpop.f32.mrf.mxu1 }
 0x54d   :  { %v4326_v51 = vadd.f32 %v4320_v34, %v4166_v44  ;;  %v4165_v55 = vadd.f32 %v4091_v33, %v4005_v47 }
 0x54e   :  { %v4249_v39 = vpop.f32.mrf.mxu0  ;;  %v5030_v41 = vpop.f32.mrf.mxu1 }
 0x54f   :  { %v4324_v56 = vadd.f32 %v4249_v39, %v4164_v48 }
 0x550   :  { %v4251_v45 = vpop.f32.mrf.mxu0  ;;  %v4480_v46 = vpop.f32.mrf.mxu1 }
 0x551   :  { %v4486_v57 = vadd.f32 %v4480_v46, %v4326_v51  ;;  %v4325_v62 = vadd.f32 %v4251_v45, %v4165_v55 }
 0x552   :  { %v4409_v53 = vpop.f32.mrf.mxu0  ;;  %v5035_v54 = vpop.f32.mrf.mxu1 }
 0x553   :  { %v4484_v63 = vadd.f32 %v4409_v53, %v4324_v56 }
 0x554   :  { %v4411_v59 = vpop.f32.mrf.mxu0  ;;  %v4640_v60 = vpop.f32.mrf.mxu1 }
 0x555   :  { %v4646_v0 = vadd.f32 %v4640_v60, %v4486_v57  ;;  %v4485_v4 = vadd.f32 %v4411_v59, %v4325_v62 }
 0x556   :  { %v4569_v2 = vpop.f32.mrf.mxu0  ;;  %v5040_v29 = vpop.f32.mrf.mxu1 }
 0x557   :  { %v4655_v40 = vadd.f32 %v4651_v22, %v4646_v0  ;;  %v4644_v5 = vadd.f32 %v4569_v2, %v4484_v63 }
 0x558   :  { %v4571_v6 = vpop.f32.mrf.mxu0 }
 0x559   :  { %v4667_v36 = vrot.slane %v4655_v40, %v4658_v61  ;;  %v4696_v7 = vrot.slane %v4655_v40, %v4687_v1  ;;  %v4653_v8 = vadd.f32 %v4651_v22, %v4644_v5  ;;  %v4645_v9 = vadd.f32 %v4571_v6, %v4485_v4 }
 0x55b   :  { %v4659_v13 = vrot.slane %v4653_v8, %v4658_v61  ;;  %v4688_v3 = vrot.slane %v4653_v8, %v4687_v1  ;;  %v4684_v49 = vmul.f32 %v4676_v52, %v4667_v36  ;;  %v4729_v14 = vmul.f32 %v4696_v7, %v4676_v52 }
 0x55c   :  { %v4654_v15 = vadd.f32 %v4651_v22, %v4645_v9  ;;  %v4713_v16 = vmul.f32 %v4705_v10, %v4696_v7  ;;  %v4726_v17 = vmul.f32 %v4705_v10, %v4667_v36 }
 0x55d   :  { %v4682_v19 = vmul.f32 %v4677_v11, %v4659_v13  ;;  %v4727_v20 = vmul.f32 %v4688_v3, %v4677_v11  ;;  %v4711_v21 = vmul.f32 %v4706_v12, %v4688_v3  ;;  %v4724_v24 = vmul.f32 %v4706_v12, %v4659_v13 }
 0x55e   :  { %v4663_v25 = vrot.slane %v4654_v15, %v4658_v61  ;;  %v4692_v26 = vrot.slane %v4654_v15, %v4687_v1  ;;  %v4716_v27 = vsub.f32 %v4684_v49, %v4713_v16  ;;  %v4732_v28 = vadd.f32 %v4729_v14, %v4726_v17 }
 0x55f   :  { %v4714_v34 = vsub.f32 %v4682_v19, %v4711_v21  ;;  %v4730_v23 = vadd.f32 %v4727_v20, %v4724_v24 }
 0x560   :  { %v4683_v31 = vmul.f32 %v4678_v30, %v4663_v25  ;;  %v4728_v32 = vmul.f32 %v4692_v26, %v4678_v30  ;;  %4723 = vst.msk [vmem:[%s5766_s11 + $0x8] sm:$0xf] %vm4722_vm4, %v4716_v27  ;;  %4738 = vst.msk [vmem:[%s5767_s12 + $0x8] sm:$0xf] %vm4722_vm4, %v4732_v28  ;;  %v4712_v22 = vmul.f32 %v4707_v18, %v4692_v26 }
 0x561   :  { %v4725_v33 = vmul.f32 %v4707_v18, %v4663_v25 }
 0x562   :  { %v4715_v35 = vsub.f32 %v4683_v31, %v4712_v22 }
 0x563   :  { %v4731_v37 = vadd.f32 %v4728_v32, %v4725_v33 }
 0x564   :  { %v4719_v39 = vcombine.low %v4714_v34, %v4715_v35 }
 0x565   :  { %v4735_v38 = vcombine.low %v4730_v23, %v4731_v37 }
 0x566   :  { %4721 = vst [vmem:[%s5766_s11] sm:$0xff] %v4719_v39 }
 0x567   :  { %4737 = vst [vmem:[%s5767_s12] sm:$0xff] %v4735_v38 }

</bundles_post_ra>
